<compile_context>
chip_gen: v5e
topology: v5e:2x2
jax: 0.10.0
libtpu: 0.0.40
codegen_flags: <defaults>
</compile_context>

<pallas_src>
import functools
import numpy as np
import jax
import jax.numpy as jnp
from jax import lax
from jax.experimental import pallas as pl
from jax.experimental.pallas import tpu as pltpu

# ---------------- configuration (small synthetic shapes) ----------------
B = 4            # number of pedestrians in the batch
PAST_LEN = 8
FUT_LEN = 12
CH = 16          # st_encoder conv channels
H = 32           # st_encoder GRU hidden (= per-encoder embedding)
D = 2 * H        # state_past dim (= module's dim_embedding_key)
HD = 2 * H       # fused (two-encoder) GRU hidden
M = 512          # memory bank size (must be >= 200)
K = 200          # number of memory entries selected per sample
HQ = 128         # selector MLP hidden dim
DQ = 64          # selector MLP output dim (query/key dim)
HP = 64          # social-pooling placeholder hidden dim
EPS = 1e-12      # F.normalize eps

VMEM_SPEC = pl.BlockSpec(memory_space=pltpu.MemorySpace.VMEM)


# ---------------- the single fused forward kernel ----------------
def fused_forward_kernel(xcol_ref, wc_ref, gruw_ref, b_ref, spw1_ref, spw2_ref,
                         oht_ref, pose_ref, wq_ref, bank_ref, out_ref, *, t_len, bp):
    f32 = jnp.float32

    # ---- biases (single (8, 192) slab, one DMA) ----
    bc = b_ref[0:1, 0:2 * CH]        # (1, 32)   conv bias (both encoders)
    bi = b_ref[1:2, :]               # (1, 192)  GRU input-gate biases [r|z|n]
    bh = b_ref[2:3, :]               # (1, 192)  GRU hidden-gate biases
    sb1 = b_ref[3:4, 0:HP]           # (1, 64)
    sb2 = b_ref[4:5, 0:H]            # (1, 32)
    bq1 = b_ref[5:6, 0:HQ]           # (1, 128)
    bq2 = b_ref[6:7, 0:HQ]           # (1, 128)  lanes DQ: are zero (padding)

    # ---- fused dual st_encoder: Conv1d(k=3,pad=1) tap + ReLU + GRU, both encoders ----
    # Conv tap + ReLU and the input-side GRU gate pre-activations for ALL time steps are
    # hoisted into two batched matmuls; the recurrence issues one MXU push per step.
    x = xcol_ref[...]                                                        # (T*BP, 12)
    ct = jax.nn.relu(jnp.dot(x, wc_ref[...], preferred_element_type=f32) + bc)   # (T*BP, 32)
    wi = gruw_ref[0:2 * CH, :]                                               # (32, 192)
    wh = gruw_ref[2 * CH:2 * CH + HD, :]                                     # (64, 192)
    gi = jnp.dot(ct, wi, preferred_element_type=f32) + bi                    # (T*BP, 192)

    h = jnp.zeros((bp, HD), f32)
    for t in range(t_len):                    # T=8, static unroll
        gh = jnp.dot(h, wh, preferred_element_type=f32) + bh                 # (BP, 192)
        gi_t = gi[t * bp:(t + 1) * bp, :]                                    # sublane-aligned (bp=8)
        rz = jax.nn.sigmoid(gi_t[:, 0:2 * HD] + gh[:, 0:2 * HD])             # one 128-lane tile
        r = rz[:, 0:HD]
        z = rz[:, HD:2 * HD]
        n = jnp.tanh(gi_t[:, 2 * HD:] + r * gh[:, 2 * HD:])
        h = (1.0 - z) * n + z * h

    norm_state = h[:, 0:H]            # (BP, 32)  norm_past encoder hidden
    abs_state = h[:, H:2 * H]         # (BP, 32)  abs_past encoder hidden

    # ---- social pooling (placeholder): embed -> per-scene masked max -> project ----
    # TODO(synk): pretrained_model.social_pooling_X is an NmpNet whose architecture is not
    # given in the module; implemented as embed -> segment-max -> project.
    end_pose = pose_ref[:, 0:2]                                              # (BP, 2)
    feat = jnp.concatenate([abs_state, end_pose], axis=1)                    # (BP, 34)
    hsp = jax.nn.relu(jnp.dot(feat, spw1_ref[...], preferred_element_type=f32) + sb1)  # (BP, 64)
    oht = oht_ref[...]                                                       # (BP, G) one-hot
    pooled_rows = []
    for g in range(oht.shape[1]):                                            # G static, tiny
        m = oht[:, g:g + 1] > 0.5
        pooled_rows.append(jnp.max(jnp.where(m, hsp, -1e30), axis=0, keepdims=True))
    pooled = jnp.concatenate(pooled_rows, axis=0)                            # (G, 64)
    back = jnp.dot(oht, pooled, preferred_element_type=f32)                  # (BP, 64)
    social = jnp.dot(back, spw2_ref[...], preferred_element_type=f32) + sb2  # (BP, 32)

    state_past = jnp.concatenate([norm_state, social], axis=1)               # (BP, 64)

    # ---- cosine similarity vs precomputed L2-normalized bank (get_memory_index) ----
    ss = jnp.sum(state_past * state_past, axis=-1, keepdims=True)
    sn = state_past * lax.rsqrt(jnp.maximum(ss, EPS * EPS))                  # == x / max(||x||, eps)
    mem_norm_t = bank_ref[0:D, :]                                            # (64, 512)
    sim = jnp.dot(sn, mem_norm_t, preferred_element_type=f32)                # (BP, 512)

    # ---- query MLP (key MLP over the bank is precomputed & zero-padded to 128 lanes) ----
    wq1 = wq_ref[0:D, :]                                                     # (64, 128)
    wq2p = wq_ref[D:D + HQ, :]                                               # (128, 128), lanes DQ: zero
    q = jax.nn.relu(jnp.dot(state_past, wq1, preferred_element_type=f32) + bq1)   # (BP, 128)
    q = jnp.dot(q, wq2p, preferred_element_type=f32) + bq2                   # (BP, 128), lanes DQ: zero
    qs = jnp.sum(q * q, axis=-1, keepdims=True)
    qn = q * lax.rsqrt(jnp.maximum(qs, EPS * EPS))
    kn_t = bank_ref[D:D + HQ, :]                                             # (128, 512), rows DQ: zero
    weight = jnp.dot(qn, kn_t, preferred_element_type=f32)                   # (BP, 512)

    # ---- L2 distance from each gt destination to every bank destination ----
    dest_t = bank_ref[D + HQ:D + HQ + 2, :]                                  # (2, 512)
    gx = pose_ref[:, 2:3]
    gy = pose_ref[:, 3:4]
    dx = gx - dest_t[0:1, :]
    dy = gy - dest_t[1:2, :]
    dist = jnp.sqrt(dx * dx + dy * dy)                                       # (BP, 512)

    out_ref[0] = sim
    out_ref[1] = weight
    out_ref[2] = dist


# ---------------- XLA glue: im2col + padding + top-K gather ----------------
def _im2col(traj):
    """(B, T, 2) -> (T, B, 6): Conv1d(k=3, pad=1) taps laid out for a matmul."""
    b, t, _ = traj.shape
    xp = jnp.pad(traj, ((0, 0), (1, 1), (0, 0)))
    xcol = jnp.concatenate([xp[:, :t], xp[:, 1:t + 1], xp[:, 2:t + 2]], axis=-1)  # (B, T, 6)
    return jnp.transpose(xcol, (1, 0, 2))                                          # (T, B, 6)


def model_encdec_forward(params, past, abs_past, seg_ids, end_pose, future, *, num_groups):
    b, t, _ = past.shape
    bp = ((b + 7) // 8) * 8                      # pad agent rows to a full sublane tile

    # encoder input: im2col of [past | abs_past], rows ordered (t, agent), padded to BP agents
    xcol = jnp.concatenate([_im2col(past), _im2col(abs_past)], axis=-1)      # (T, B, 12)
    xcol = jnp.pad(xcol, ((0, 0), (0, bp - b), (0, 0))).reshape(t * bp, 12)

    gt_dest = future[:, -1]                                                  # (B, 2)
    pose = jnp.pad(jnp.concatenate([end_pose, gt_dest], axis=1),
                   ((0, bp - b), (0, 0)))                                    # (BP, 4)
    onehot_t = jnp.pad(jax.nn.one_hot(seg_ids, num_groups, dtype=jnp.float32),
                       ((0, bp - b), (0, 0)))                                # (BP, G)

    args = (xcol, params['enc_wc'], params['enc_gru_w'], params['bias_slab'],
            params['sp_w1'], params['sp_w2'], onehot_t, pose,
            params['wq_slab'], params['bank_slab'])

    out = pl.pallas_call(
        functools.partial(fused_forward_kernel, t_len=t, bp=bp),
        out_shape=jax.ShapeDtypeStruct((3, bp, M), jnp.float32),
        in_specs=[VMEM_SPEC] * len(args),
        out_specs=VMEM_SPEC,
    )(*args)

    sim = out[0, :b]                                                         # (B, 512)
    wd = out[1:3, :b, :]                                                     # (2, B, 512)

    # top-200 by cosine sim (== torch.sort(descending=True) indices up to tie order);
    # one stacked gather fetches both weight_read and distance.
    _, idx = lax.top_k(sim, K)                                               # (B, K)
    gathered = jnp.take_along_axis(wd, jnp.broadcast_to(idx[None], (2, b, K)), axis=2)
    return gathered[0], gathered[1]                                          # (B, K), (B, K)


# ---------------- deterministic parameter init ----------------
class KeyGen:
    def __init__(self, key):
        self.key = key
        self.i = 0

    def __call__(self):
        self.i += 1
        return jax.random.fold_in(self.key, self.i)


def init_params(key):
    kg = KeyGen(key)

    def nrm(shape, scale=0.1):
        return scale * jax.random.normal(kg(), shape, jnp.float32)

    def enc_params():
        return dict(
            wc=nrm((6, CH)), bc=nrm((1, CH), 0.01),
            wir=nrm((CH, H)), wiz=nrm((CH, H)), win=nrm((CH, H)),
            whr=nrm((H, H)), whz=nrm((H, H)), whn=nrm((H, H)),
            bir=nrm((1, H), 0.01), biz=nrm((1, H), 0.01), bin=nrm((1, H), 0.01),
            bhr=nrm((1, H), 0.01), bhz=nrm((1, H), 0.01), bhn=nrm((1, H), 0.01))

    return dict(
        norm_past_encoder=enc_params(),
        abs_past_encoder=enc_params(),
        norm_fut_encoder=enc_params(),      # present in the module, unused on this path
        social_pooling_X=dict(w1=nrm((H + 2, HP)), b1=nrm((HP,), 0.01),
                              w2=nrm((HP, H)), b2=nrm((H,), 0.01)),
        selector=dict(wq1=nrm((D, HQ)), bq1=nrm((1, HQ), 0.01),
                      wq2=nrm((HQ, DQ)), bq2=nrm((1, DQ), 0.01),
                      wm1=nrm((D, HQ)), bm1=nrm((1, HQ), 0.01),
                      wm2=nrm((HQ, DQ)), bm2=nrm((1, DQ), 0.01)),
        # synthetic memory banks (reference loads them with torch.load)
        memory_past=nrm((M, D), 1.0),
        memory_fut=nrm((M, H), 1.0),
        memory_dest=nrm((M, 2), 1.0),
    )


# ---------------- one-time host-side fusion & precompute ----------------
def _block_diag(a, b):
    top = jnp.concatenate([a, jnp.zeros((a.shape[0], b.shape[1]), a.dtype)], axis=1)
    bot = jnp.concatenate([jnp.zeros((b.shape[0], a.shape[1]), b.dtype), b], axis=1)
    return jnp.concatenate([top, bot], axis=0)


def fuse_two_encoders(e1, e2):
    """Pack two st_encoders so they run side-by-side in the lane dim of one kernel."""
    wc = _block_diag(e1['wc'], e2['wc'])                                   # (12, 2*CH)
    bc = jnp.concatenate([e1['bc'], e2['bc']], axis=1)                     # (1, 2*CH)
    wi = jnp.concatenate([_block_diag(e1['wir'], e2['wir']),
                          _block_diag(e1['wiz'], e2['wiz']),
                          _block_diag(e1['win'], e2['win'])], axis=1)      # (2*CH, 3*HD)
    wh = jnp.concatenate([_block_diag(e1['whr'], e2['whr']),
                          _block_diag(e1['whz'], e2['whz']),
                          _block_diag(e1['whn'], e2['whn'])], axis=1)      # (HD, 3*HD)
    bi = jnp.concatenate([e1['bir'], e2['bir'], e1['biz'], e2['biz'],
                          e1['bin'], e2['bin']], axis=1)                   # (1, 3*HD)
    bh = jnp.concatenate([e1['bhr'], e2['bhr'], e1['bhz'], e2['bhz'],
                          e1['bhn'], e2['bhn']], axis=1)                   # (1, 3*HD)
    return dict(wc=wc, bc=bc, wi=wi, bi=bi, wh=wh, bh=bh)


def prepare_params(params):
    """One-time prep: fused encoder weights, operand slabs, and precomputed bank quantities.
    Must be re-run if memory banks / selector / encoder params ever change."""
    width = 3 * HD                                         # 192 (widest bias row)

    def padrow(v):
        v = jnp.asarray(v, jnp.float32).reshape(1, -1)
        return jnp.pad(v, ((0, 0), (0, width - v.shape[1])))

    fused = fuse_two_encoders(params['norm_past_encoder'], params['abs_past_encoder'])
    sp = params['social_pooling_X']
    sel = params['selector']

    p = {}
    p['enc_wc'] = fused['wc']                                              # (12, 32)
    p['enc_gru_w'] = jnp.concatenate([fused['wi'], fused['wh']], axis=0)   # (96, 192)
    p['bias_slab'] = jnp.concatenate([
        padrow(fused['bc']), padrow(fused['bi']), padrow(fused['bh']),
        padrow(sp['b1']), padrow(sp['b2']),
        padrow(sel['bq1']), padrow(sel['bq2']),
        jnp.zeros((1, width), jnp.float32)], axis=0)                       # (8, 192)
    p['sp_w1'] = sp['w1']                                                  # (34, 64)
    p['sp_w2'] = sp['w2']                                                  # (64, 32)

    # query MLP slab: [wq1 ; wq2 zero-padded to HQ output lanes]
    wq2_pad = jnp.pad(sel['wq2'], ((0, 0), (0, HQ - DQ)))                  # (128, 128)
    p['wq_slab'] = jnp.concatenate([sel['wq1'], wq2_pad], axis=0)          # (192, 128)

    # precomputed static bank-side quantities, transposed & lane-dense over M
    mp = params['memory_past']                                             # (M, D)
    mp_n = mp / jnp.maximum(jnp.sqrt(jnp.sum(mp * mp, axis=1, keepdims=True)), EPS)
    kk = jax.nn.relu(mp @ sel['wm1'] + sel['bm1']) @ sel['wm2'] + sel['bm2']   # (M, DQ)
    kn = kk / jnp.maximum(jnp.sqrt(jnp.sum(kk * kk, axis=1, keepdims=True)), EPS)
    kn_pad = jnp.pad(kn, ((0, 0), (0, HQ - DQ)))                           # (M, 128)
    dest_t = jnp.transpose(params['memory_dest'])                          # (2, M)
    p['bank_slab'] = jnp.concatenate(
        [jnp.transpose(mp_n), jnp.transpose(kn_pad), dest_t,
         jnp.zeros((6, M), jnp.float32)], axis=0)                          # (200, M)
    return p


if __name__ == "__main__":
    root = jax.random.PRNGKey(0)
    params = prepare_params(init_params(root))

    kg = KeyGen(jax.random.fold_in(root, 12345))
    past = jax.random.normal(kg(), (B, PAST_LEN, 2), jnp.float32)
    abs_past = jax.random.normal(kg(), (B, PAST_LEN, 2), jnp.float32)
    future = jax.random.normal(kg(), (B, FUT_LEN, 2), jnp.float32)
    end_pose = jax.random.normal(kg(), (B, 2), jnp.float32)

    # seq_start_end = [(0, 2), (2, 4)] -> per-agent scene ids
    seq_start_end = np.array([[0, 2], [2, B]], dtype=np.int32)
    seg_ids_np = np.zeros((B,), dtype=np.int32)
    for g, (s, e) in enumerate(seq_start_end):
        seg_ids_np[s:e] = g
    seg_ids = jnp.asarray(seg_ids_np)
    num_groups = int(seq_start_end.shape[0])

    fwd = jax.jit(model_encdec_forward, static_argnames=("num_groups",))
    weight_read, distance = fwd(params, past, abs_past, seg_ids, end_pose, future,
                                num_groups=num_groups)
    weight_read, distance = jax.block_until_ready((weight_read, distance))

    assert weight_read.shape == (B, K), weight_read.shape
    assert distance.shape == (B, K), distance.shape
    assert jnp.all(jnp.isfinite(weight_read)) and jnp.all(jnp.isfinite(distance))
    print("KERNEL_OK")
</pallas_src>

<mosaic_0001>
module attributes {stable_mosaic.version = 11 : i64} {
  func.func @fused_forward_kernel(%arg0: memref<64x12xf32, #tpu.memory_space<vmem>>, %arg1: memref<12x32xf32, #tpu.memory_space<vmem>>, %arg2: memref<96x192xf32, #tpu.memory_space<vmem>>, %arg3: memref<8x192xf32, #tpu.memory_space<vmem>>, %arg4: memref<34x64xf32, #tpu.memory_space<vmem>>, %arg5: memref<64x32xf32, #tpu.memory_space<vmem>>, %arg6: memref<8x2xf32, #tpu.memory_space<vmem>>, %arg7: memref<8x4xf32, #tpu.memory_space<vmem>>, %arg8: memref<192x128xf32, #tpu.memory_space<vmem>>, %arg9: memref<200x512xf32, #tpu.memory_space<vmem>>, %arg10: memref<3x8x512xf32, #tpu.memory_space<vmem>>) attributes {dimension_semantics = [], scalar_prefetch = 0 : i64, scratch_operands = 0 : i64, tpu.core_type = #tpu.core_type<tc>} {
    %c0 = arith.constant 0 : index
    %c0_0 = arith.constant 0 : index
    %0 = vector.load %arg3[%c0, %c0_0] : memref<8x192xf32, #tpu.memory_space<vmem>>, vector<1x32xf32>
    %c1 = arith.constant 1 : index
    %c0_1 = arith.constant 0 : index
    %1 = vector.load %arg3[%c1, %c0_1] : memref<8x192xf32, #tpu.memory_space<vmem>>, vector<1x192xf32>
    %c2 = arith.constant 2 : index
    %c0_2 = arith.constant 0 : index
    %2 = vector.load %arg3[%c2, %c0_2] : memref<8x192xf32, #tpu.memory_space<vmem>>, vector<1x192xf32>
    %c3 = arith.constant 3 : index
    %c0_3 = arith.constant 0 : index
    %3 = vector.load %arg3[%c3, %c0_3] : memref<8x192xf32, #tpu.memory_space<vmem>>, vector<1x64xf32>
    %c4 = arith.constant 4 : index
    %c0_4 = arith.constant 0 : index
    %4 = vector.load %arg3[%c4, %c0_4] : memref<8x192xf32, #tpu.memory_space<vmem>>, vector<1x32xf32>
    %c5 = arith.constant 5 : index
    %c0_5 = arith.constant 0 : index
    %5 = vector.load %arg3[%c5, %c0_5] : memref<8x192xf32, #tpu.memory_space<vmem>>, vector<1x128xf32>
    %c6 = arith.constant 6 : index
    %c0_6 = arith.constant 0 : index
    %6 = vector.load %arg3[%c6, %c0_6] : memref<8x192xf32, #tpu.memory_space<vmem>>, vector<1x128xf32>
    %c0_7 = arith.constant 0 : index
    %c0_8 = arith.constant 0 : index
    %7 = vector.load %arg0[%c0_7, %c0_8] : memref<64x12xf32, #tpu.memory_space<vmem>>, vector<64x12xf32>
    %c0_9 = arith.constant 0 : index
    %c0_10 = arith.constant 0 : index
    %8 = vector.load %arg1[%c0_9, %c0_10] : memref<12x32xf32, #tpu.memory_space<vmem>>, vector<12x32xf32>
    %cst = arith.constant dense<0.000000e+00> : vector<64x32xf32>
    %9 = tpu.matmul %7, %8, %cst {dimension_numbers = #tpu.dot_dimension_numbers<[1], [0], [0], [1], [0, 0, 1, 1], [], []>} : vector<64x12xf32>, vector<12x32xf32>, vector<64x32xf32> -> vector<64x32xf32>
    %10 = vector.broadcast %0 : vector<1x32xf32> to vector<64x32xf32>
    %11 = arith.addf %9, %10 : vector<64x32xf32>
    %cst_11 = arith.constant 0.000000e+00 : f32
    %12 = vector.broadcast %cst_11 : f32 to vector<64x32xf32>
    %13 = arith.maximumf %11, %12 : vector<64x32xf32>
    %c0_12 = arith.constant 0 : index
    %c0_13 = arith.constant 0 : index
    %14 = vector.load %arg2[%c0_12, %c0_13] : memref<96x192xf32, #tpu.memory_space<vmem>>, vector<32x192xf32>
    %c32 = arith.constant 32 : index
    %c0_14 = arith.constant 0 : index
    %15 = vector.load %arg2[%c32, %c0_14] : memref<96x192xf32, #tpu.memory_space<vmem>>, vector<64x192xf32>
    %cst_15 = arith.constant dense<0.000000e+00> : vector<64x192xf32>
    %16 = tpu.matmul %13, %14, %cst_15 {dimension_numbers = #tpu.dot_dimension_numbers<[1], [0], [0], [1], [0, 0, 1, 1], [], []>} : vector<64x32xf32>, vector<32x192xf32>, vector<64x192xf32> -> vector<64x192xf32>
    %17 = vector.broadcast %1 : vector<1x192xf32> to vector<64x192xf32>
    %18 = arith.addf %16, %17 : vector<64x192xf32>
    %cst_16 = arith.constant 0.000000e+00 : f32
    %19 = vector.broadcast %cst_16 : f32 to vector<8x64xf32>
    %cst_17 = arith.constant dense<0.000000e+00> : vector<8x192xf32>
    %20 = tpu.matmul %19, %15, %cst_17 {dimension_numbers = #tpu.dot_dimension_numbers<[1], [0], [0], [1], [0, 0, 1, 1], [], []>} : vector<8x64xf32>, vector<64x192xf32>, vector<8x192xf32> -> vector<8x192xf32>
    %21 = vector.broadcast %2 : vector<1x192xf32> to vector<8x192xf32>
    %22 = arith.addf %20, %21 : vector<8x192xf32>
    %23 = vector.extract_strided_slice %18 {offsets = [0, 0], sizes = [8, 192], strides = [1, 1]} : vector<64x192xf32> to vector<8x192xf32>
    %24 = vector.extract_strided_slice %23 {offsets = [0, 0], sizes = [8, 128], strides = [1, 1]} : vector<8x192xf32> to vector<8x128xf32>
    %25 = vector.extract_strided_slice %22 {offsets = [0, 0], sizes = [8, 128], strides = [1, 1]} : vector<8x192xf32> to vector<8x128xf32>
    %26 = arith.addf %24, %25 : vector<8x128xf32>
    %27 = arith.negf %26 : vector<8x128xf32>
    %28 = math.exp %27 : vector<8x128xf32>
    %cst_18 = arith.constant 1.000000e+00 : f32
    %29 = vector.broadcast %cst_18 : f32 to vector<8x128xf32>
    %30 = arith.addf %29, %28 : vector<8x128xf32>
    %31 = arith.divf %29, %30 : vector<8x128xf32>
    %32 = vector.extract_strided_slice %31 {offsets = [0, 0], sizes = [8, 64], strides = [1, 1]} : vector<8x128xf32> to vector<8x64xf32>
    %33 = vector.extract_strided_slice %31 {offsets = [0, 64], sizes = [8, 64], strides = [1, 1]} : vector<8x128xf32> to vector<8x64xf32>
    %34 = vector.extract_strided_slice %23 {offsets = [0, 128], sizes = [8, 64], strides = [1, 1]} : vector<8x192xf32> to vector<8x64xf32>
    %35 = vector.extract_strided_slice %22 {offsets = [0, 128], sizes = [8, 64], strides = [1, 1]} : vector<8x192xf32> to vector<8x64xf32>
    %36 = arith.mulf %32, %35 : vector<8x64xf32>
    %37 = arith.addf %34, %36 : vector<8x64xf32>
    %38 = math.tanh %37 : vector<8x64xf32>
    %cst_19 = arith.constant 1.000000e+00 : f32
    %39 = vector.broadcast %cst_19 : f32 to vector<8x64xf32>
    %40 = arith.subf %39, %33 : vector<8x64xf32>
    %41 = arith.mulf %40, %38 : vector<8x64xf32>
    %42 = arith.mulf %33, %19 : vector<8x64xf32>
    %43 = arith.addf %41, %42 : vector<8x64xf32>
    %cst_20 = arith.constant dense<0.000000e+00> : vector<8x192xf32>
    %44 = tpu.matmul %43, %15, %cst_20 {dimension_numbers = #tpu.dot_dimension_numbers<[1], [0], [0], [1], [0, 0, 1, 1], [], []>} : vector<8x64xf32>, vector<64x192xf32>, vector<8x192xf32> -> vector<8x192xf32>
    %45 = vector.broadcast %2 : vector<1x192xf32> to vector<8x192xf32>
    %46 = arith.addf %44, %45 : vector<8x192xf32>
    %47 = vector.extract_strided_slice %18 {offsets = [8, 0], sizes = [8, 192], strides = [1, 1]} : vector<64x192xf32> to vector<8x192xf32>
    %48 = vector.extract_strided_slice %47 {offsets = [0, 0], sizes = [8, 128], strides = [1, 1]} : vector<8x192xf32> to vector<8x128xf32>
    %49 = vector.extract_strided_slice %46 {offsets = [0, 0], sizes = [8, 128], strides = [1, 1]} : vector<8x192xf32> to vector<8x128xf32>
    %50 = arith.addf %48, %49 : vector<8x128xf32>
    %51 = arith.negf %50 : vector<8x128xf32>
    %52 = math.exp %51 : vector<8x128xf32>
    %cst_21 = arith.constant 1.000000e+00 : f32
    %53 = vector.broadcast %cst_21 : f32 to vector<8x128xf32>
    %54 = arith.addf %53, %52 : vector<8x128xf32>
    %55 = arith.divf %53, %54 : vector<8x128xf32>
    %56 = vector.extract_strided_slice %55 {offsets = [0, 0], sizes = [8, 64], strides = [1, 1]} : vector<8x128xf32> to vector<8x64xf32>
    %57 = vector.extract_strided_slice %55 {offsets = [0, 64], sizes = [8, 64], strides = [1, 1]} : vector<8x128xf32> to vector<8x64xf32>
    %58 = vector.extract_strided_slice %47 {offsets = [0, 128], sizes = [8, 64], strides = [1, 1]} : vector<8x192xf32> to vector<8x64xf32>
    %59 = vector.extract_strided_slice %46 {offsets = [0, 128], sizes = [8, 64], strides = [1, 1]} : vector<8x192xf32> to vector<8x64xf32>
    %60 = arith.mulf %56, %59 : vector<8x64xf32>
    %61 = arith.addf %58, %60 : vector<8x64xf32>
    %62 = math.tanh %61 : vector<8x64xf32>
    %cst_22 = arith.constant 1.000000e+00 : f32
    %63 = vector.broadcast %cst_22 : f32 to vector<8x64xf32>
    %64 = arith.subf %63, %57 : vector<8x64xf32>
    %65 = arith.mulf %64, %62 : vector<8x64xf32>
    %66 = arith.mulf %57, %43 : vector<8x64xf32>
    %67 = arith.addf %65, %66 : vector<8x64xf32>
    %cst_23 = arith.constant dense<0.000000e+00> : vector<8x192xf32>
    %68 = tpu.matmul %67, %15, %cst_23 {dimension_numbers = #tpu.dot_dimension_numbers<[1], [0], [0], [1], [0, 0, 1, 1], [], []>} : vector<8x64xf32>, vector<64x192xf32>, vector<8x192xf32> -> vector<8x192xf32>
    %69 = vector.broadcast %2 : vector<1x192xf32> to vector<8x192xf32>
    %70 = arith.addf %68, %69 : vector<8x192xf32>
    %71 = vector.extract_strided_slice %18 {offsets = [16, 0], sizes = [8, 192], strides = [1, 1]} : vector<64x192xf32> to vector<8x192xf32>
    %72 = vector.extract_strided_slice %71 {offsets = [0, 0], sizes = [8, 128], strides = [1, 1]} : vector<8x192xf32> to vector<8x128xf32>
    %73 = vector.extract_strided_slice %70 {offsets = [0, 0], sizes = [8, 128], strides = [1, 1]} : vector<8x192xf32> to vector<8x128xf32>
    %74 = arith.addf %72, %73 : vector<8x128xf32>
    %75 = arith.negf %74 : vector<8x128xf32>
    %76 = math.exp %75 : vector<8x128xf32>
    %cst_24 = arith.constant 1.000000e+00 : f32
    %77 = vector.broadcast %cst_24 : f32 to vector<8x128xf32>
    %78 = arith.addf %77, %76 : vector<8x128xf32>
    %79 = arith.divf %77, %78 : vector<8x128xf32>
    %80 = vector.extract_strided_slice %79 {offsets = [0, 0], sizes = [8, 64], strides = [1, 1]} : vector<8x128xf32> to vector<8x64xf32>
    %81 = vector.extract_strided_slice %79 {offsets = [0, 64], sizes = [8, 64], strides = [1, 1]} : vector<8x128xf32> to vector<8x64xf32>
    %82 = vector.extract_strided_slice %71 {offsets = [0, 128], sizes = [8, 64], strides = [1, 1]} : vector<8x192xf32> to vector<8x64xf32>
    %83 = vector.extract_strided_slice %70 {offsets = [0, 128], sizes = [8, 64], strides = [1, 1]} : vector<8x192xf32> to vector<8x64xf32>
    %84 = arith.mulf %80, %83 : vector<8x64xf32>
    %85 = arith.addf %82, %84 : vector<8x64xf32>
    %86 = math.tanh %85 : vector<8x64xf32>
    %cst_25 = arith.constant 1.000000e+00 : f32
    %87 = vector.broadcast %cst_25 : f32 to vector<8x64xf32>
    %88 = arith.subf %87, %81 : vector<8x64xf32>
    %89 = arith.mulf %88, %86 : vector<8x64xf32>
    %90 = arith.mulf %81, %67 : vector<8x64xf32>
    %91 = arith.addf %89, %90 : vector<8x64xf32>
    %cst_26 = arith.constant dense<0.000000e+00> : vector<8x192xf32>
    %92 = tpu.matmul %91, %15, %cst_26 {dimension_numbers = #tpu.dot_dimension_numbers<[1], [0], [0], [1], [0, 0, 1, 1], [], []>} : vector<8x64xf32>, vector<64x192xf32>, vector<8x192xf32> -> vector<8x192xf32>
    %93 = vector.broadcast %2 : vector<1x192xf32> to vector<8x192xf32>
    %94 = arith.addf %92, %93 : vector<8x192xf32>
    %95 = vector.extract_strided_slice %18 {offsets = [24, 0], sizes = [8, 192], strides = [1, 1]} : vector<64x192xf32> to vector<8x192xf32>
    %96 = vector.extract_strided_slice %95 {offsets = [0, 0], sizes = [8, 128], strides = [1, 1]} : vector<8x192xf32> to vector<8x128xf32>
    %97 = vector.extract_strided_slice %94 {offsets = [0, 0], sizes = [8, 128], strides = [1, 1]} : vector<8x192xf32> to vector<8x128xf32>
    %98 = arith.addf %96, %97 : vector<8x128xf32>
    %99 = arith.negf %98 : vector<8x128xf32>
    %100 = math.exp %99 : vector<8x128xf32>
    %cst_27 = arith.constant 1.000000e+00 : f32
    %101 = vector.broadcast %cst_27 : f32 to vector<8x128xf32>
    %102 = arith.addf %101, %100 : vector<8x128xf32>
    %103 = arith.divf %101, %102 : vector<8x128xf32>
    %104 = vector.extract_strided_slice %103 {offsets = [0, 0], sizes = [8, 64], strides = [1, 1]} : vector<8x128xf32> to vector<8x64xf32>
    %105 = vector.extract_strided_slice %103 {offsets = [0, 64], sizes = [8, 64], strides = [1, 1]} : vector<8x128xf32> to vector<8x64xf32>
    %106 = vector.extract_strided_slice %95 {offsets = [0, 128], sizes = [8, 64], strides = [1, 1]} : vector<8x192xf32> to vector<8x64xf32>
    %107 = vector.extract_strided_slice %94 {offsets = [0, 128], sizes = [8, 64], strides = [1, 1]} : vector<8x192xf32> to vector<8x64xf32>
    %108 = arith.mulf %104, %107 : vector<8x64xf32>
    %109 = arith.addf %106, %108 : vector<8x64xf32>
    %110 = math.tanh %109 : vector<8x64xf32>
    %cst_28 = arith.constant 1.000000e+00 : f32
    %111 = vector.broadcast %cst_28 : f32 to vector<8x64xf32>
    %112 = arith.subf %111, %105 : vector<8x64xf32>
    %113 = arith.mulf %112, %110 : vector<8x64xf32>
    %114 = arith.mulf %105, %91 : vector<8x64xf32>
    %115 = arith.addf %113, %114 : vector<8x64xf32>
    %cst_29 = arith.constant dense<0.000000e+00> : vector<8x192xf32>
    %116 = tpu.matmul %115, %15, %cst_29 {dimension_numbers = #tpu.dot_dimension_numbers<[1], [0], [0], [1], [0, 0, 1, 1], [], []>} : vector<8x64xf32>, vector<64x192xf32>, vector<8x192xf32> -> vector<8x192xf32>
    %117 = vector.broadcast %2 : vector<1x192xf32> to vector<8x192xf32>
    %118 = arith.addf %116, %117 : vector<8x192xf32>
    %119 = vector.extract_strided_slice %18 {offsets = [32, 0], sizes = [8, 192], strides = [1, 1]} : vector<64x192xf32> to vector<8x192xf32>
    %120 = vector.extract_strided_slice %119 {offsets = [0, 0], sizes = [8, 128], strides = [1, 1]} : vector<8x192xf32> to vector<8x128xf32>
    %121 = vector.extract_strided_slice %118 {offsets = [0, 0], sizes = [8, 128], strides = [1, 1]} : vector<8x192xf32> to vector<8x128xf32>
    %122 = arith.addf %120, %121 : vector<8x128xf32>
    %123 = arith.negf %122 : vector<8x128xf32>
    %124 = math.exp %123 : vector<8x128xf32>
    %cst_30 = arith.constant 1.000000e+00 : f32
    %125 = vector.broadcast %cst_30 : f32 to vector<8x128xf32>
    %126 = arith.addf %125, %124 : vector<8x128xf32>
    %127 = arith.divf %125, %126 : vector<8x128xf32>
    %128 = vector.extract_strided_slice %127 {offsets = [0, 0], sizes = [8, 64], strides = [1, 1]} : vector<8x128xf32> to vector<8x64xf32>
    %129 = vector.extract_strided_slice %127 {offsets = [0, 64], sizes = [8, 64], strides = [1, 1]} : vector<8x128xf32> to vector<8x64xf32>
    %130 = vector.extract_strided_slice %119 {offsets = [0, 128], sizes = [8, 64], strides = [1, 1]} : vector<8x192xf32> to vector<8x64xf32>
    %131 = vector.extract_strided_slice %118 {offsets = [0, 128], sizes = [8, 64], strides = [1, 1]} : vector<8x192xf32> to vector<8x64xf32>
    %132 = arith.mulf %128, %131 : vector<8x64xf32>
    %133 = arith.addf %130, %132 : vector<8x64xf32>
    %134 = math.tanh %133 : vector<8x64xf32>
    %cst_31 = arith.constant 1.000000e+00 : f32
    %135 = vector.broadcast %cst_31 : f32 to vector<8x64xf32>
    %136 = arith.subf %135, %129 : vector<8x64xf32>
    %137 = arith.mulf %136, %134 : vector<8x64xf32>
    %138 = arith.mulf %129, %115 : vector<8x64xf32>
    %139 = arith.addf %137, %138 : vector<8x64xf32>
    %cst_32 = arith.constant dense<0.000000e+00> : vector<8x192xf32>
    %140 = tpu.matmul %139, %15, %cst_32 {dimension_numbers = #tpu.dot_dimension_numbers<[1], [0], [0], [1], [0, 0, 1, 1], [], []>} : vector<8x64xf32>, vector<64x192xf32>, vector<8x192xf32> -> vector<8x192xf32>
    %141 = vector.broadcast %2 : vector<1x192xf32> to vector<8x192xf32>
    %142 = arith.addf %140, %141 : vector<8x192xf32>
    %143 = vector.extract_strided_slice %18 {offsets = [40, 0], sizes = [8, 192], strides = [1, 1]} : vector<64x192xf32> to vector<8x192xf32>
    %144 = vector.extract_strided_slice %143 {offsets = [0, 0], sizes = [8, 128], strides = [1, 1]} : vector<8x192xf32> to vector<8x128xf32>
    %145 = vector.extract_strided_slice %142 {offsets = [0, 0], sizes = [8, 128], strides = [1, 1]} : vector<8x192xf32> to vector<8x128xf32>
    %146 = arith.addf %144, %145 : vector<8x128xf32>
    %147 = arith.negf %146 : vector<8x128xf32>
    %148 = math.exp %147 : vector<8x128xf32>
    %cst_33 = arith.constant 1.000000e+00 : f32
    %149 = vector.broadcast %cst_33 : f32 to vector<8x128xf32>
    %150 = arith.addf %149, %148 : vector<8x128xf32>
    %151 = arith.divf %149, %150 : vector<8x128xf32>
    %152 = vector.extract_strided_slice %151 {offsets = [0, 0], sizes = [8, 64], strides = [1, 1]} : vector<8x128xf32> to vector<8x64xf32>
    %153 = vector.extract_strided_slice %151 {offsets = [0, 64], sizes = [8, 64], strides = [1, 1]} : vector<8x128xf32> to vector<8x64xf32>
    %154 = vector.extract_strided_slice %143 {offsets = [0, 128], sizes = [8, 64], strides = [1, 1]} : vector<8x192xf32> to vector<8x64xf32>
    %155 = vector.extract_strided_slice %142 {offsets = [0, 128], sizes = [8, 64], strides = [1, 1]} : vector<8x192xf32> to vector<8x64xf32>
    %156 = arith.mulf %152, %155 : vector<8x64xf32>
    %157 = arith.addf %154, %156 : vector<8x64xf32>
    %158 = math.tanh %157 : vector<8x64xf32>
    %cst_34 = arith.constant 1.000000e+00 : f32
    %159 = vector.broadcast %cst_34 : f32 to vector<8x64xf32>
    %160 = arith.subf %159, %153 : vector<8x64xf32>
    %161 = arith.mulf %160, %158 : vector<8x64xf32>
    %162 = arith.mulf %153, %139 : vector<8x64xf32>
    %163 = arith.addf %161, %162 : vector<8x64xf32>
    %cst_35 = arith.constant dense<0.000000e+00> : vector<8x192xf32>
    %164 = tpu.matmul %163, %15, %cst_35 {dimension_numbers = #tpu.dot_dimension_numbers<[1], [0], [0], [1], [0, 0, 1, 1], [], []>} : vector<8x64xf32>, vector<64x192xf32>, vector<8x192xf32> -> vector<8x192xf32>
    %165 = vector.broadcast %2 : vector<1x192xf32> to vector<8x192xf32>
    %166 = arith.addf %164, %165 : vector<8x192xf32>
    %167 = vector.extract_strided_slice %18 {offsets = [48, 0], sizes = [8, 192], strides = [1, 1]} : vector<64x192xf32> to vector<8x192xf32>
    %168 = vector.extract_strided_slice %167 {offsets = [0, 0], sizes = [8, 128], strides = [1, 1]} : vector<8x192xf32> to vector<8x128xf32>
    %169 = vector.extract_strided_slice %166 {offsets = [0, 0], sizes = [8, 128], strides = [1, 1]} : vector<8x192xf32> to vector<8x128xf32>
    %170 = arith.addf %168, %169 : vector<8x128xf32>
    %171 = arith.negf %170 : vector<8x128xf32>
    %172 = math.exp %171 : vector<8x128xf32>
    %cst_36 = arith.constant 1.000000e+00 : f32
    %173 = vector.broadcast %cst_36 : f32 to vector<8x128xf32>
    %174 = arith.addf %173, %172 : vector<8x128xf32>
    %175 = arith.divf %173, %174 : vector<8x128xf32>
    %176 = vector.extract_strided_slice %175 {offsets = [0, 0], sizes = [8, 64], strides = [1, 1]} : vector<8x128xf32> to vector<8x64xf32>
    %177 = vector.extract_strided_slice %175 {offsets = [0, 64], sizes = [8, 64], strides = [1, 1]} : vector<8x128xf32> to vector<8x64xf32>
    %178 = vector.extract_strided_slice %167 {offsets = [0, 128], sizes = [8, 64], strides = [1, 1]} : vector<8x192xf32> to vector<8x64xf32>
    %179 = vector.extract_strided_slice %166 {offsets = [0, 128], sizes = [8, 64], strides = [1, 1]} : vector<8x192xf32> to vector<8x64xf32>
    %180 = arith.mulf %176, %179 : vector<8x64xf32>
    %181 = arith.addf %178, %180 : vector<8x64xf32>
    %182 = math.tanh %181 : vector<8x64xf32>
    %cst_37 = arith.constant 1.000000e+00 : f32
    %183 = vector.broadcast %cst_37 : f32 to vector<8x64xf32>
    %184 = arith.subf %183, %177 : vector<8x64xf32>
    %185 = arith.mulf %184, %182 : vector<8x64xf32>
    %186 = arith.mulf %177, %163 : vector<8x64xf32>
    %187 = arith.addf %185, %186 : vector<8x64xf32>
    %cst_38 = arith.constant dense<0.000000e+00> : vector<8x192xf32>
    %188 = tpu.matmul %187, %15, %cst_38 {dimension_numbers = #tpu.dot_dimension_numbers<[1], [0], [0], [1], [0, 0, 1, 1], [], []>} : vector<8x64xf32>, vector<64x192xf32>, vector<8x192xf32> -> vector<8x192xf32>
    %189 = vector.broadcast %2 : vector<1x192xf32> to vector<8x192xf32>
    %190 = arith.addf %188, %189 : vector<8x192xf32>
    %191 = vector.extract_strided_slice %18 {offsets = [56, 0], sizes = [8, 192], strides = [1, 1]} : vector<64x192xf32> to vector<8x192xf32>
    %192 = vector.extract_strided_slice %191 {offsets = [0, 0], sizes = [8, 128], strides = [1, 1]} : vector<8x192xf32> to vector<8x128xf32>
    %193 = vector.extract_strided_slice %190 {offsets = [0, 0], sizes = [8, 128], strides = [1, 1]} : vector<8x192xf32> to vector<8x128xf32>
    %194 = arith.addf %192, %193 : vector<8x128xf32>
    %195 = arith.negf %194 : vector<8x128xf32>
    %196 = math.exp %195 : vector<8x128xf32>
    %cst_39 = arith.constant 1.000000e+00 : f32
    %197 = vector.broadcast %cst_39 : f32 to vector<8x128xf32>
    %198 = arith.addf %197, %196 : vector<8x128xf32>
    %199 = arith.divf %197, %198 : vector<8x128xf32>
    %200 = vector.extract_strided_slice %199 {offsets = [0, 0], sizes = [8, 64], strides = [1, 1]} : vector<8x128xf32> to vector<8x64xf32>
    %201 = vector.extract_strided_slice %199 {offsets = [0, 64], sizes = [8, 64], strides = [1, 1]} : vector<8x128xf32> to vector<8x64xf32>
    %202 = vector.extract_strided_slice %191 {offsets = [0, 128], sizes = [8, 64], strides = [1, 1]} : vector<8x192xf32> to vector<8x64xf32>
    %203 = vector.extract_strided_slice %190 {offsets = [0, 128], sizes = [8, 64], strides = [1, 1]} : vector<8x192xf32> to vector<8x64xf32>
    %204 = arith.mulf %200, %203 : vector<8x64xf32>
    %205 = arith.addf %202, %204 : vector<8x64xf32>
    %206 = math.tanh %205 : vector<8x64xf32>
    %cst_40 = arith.constant 1.000000e+00 : f32
    %207 = vector.broadcast %cst_40 : f32 to vector<8x64xf32>
    %208 = arith.subf %207, %201 : vector<8x64xf32>
    %209 = arith.mulf %208, %206 : vector<8x64xf32>
    %210 = arith.mulf %201, %187 : vector<8x64xf32>
    %211 = arith.addf %209, %210 : vector<8x64xf32>
    %212 = vector.extract_strided_slice %211 {offsets = [0, 0], sizes = [8, 32], strides = [1, 1]} : vector<8x64xf32> to vector<8x32xf32>
    %213 = vector.extract_strided_slice %211 {offsets = [0, 32], sizes = [8, 32], strides = [1, 1]} : vector<8x64xf32> to vector<8x32xf32>
    %c0_41 = arith.constant 0 : index
    %c0_42 = arith.constant 0 : index
    %214 = vector.load %arg7[%c0_41, %c0_42] : memref<8x4xf32, #tpu.memory_space<vmem>>, vector<8x2xf32>
    %215 = tpu.concatenate %213, %214 in 1 : vector<8x32xf32>, vector<8x2xf32> -> vector<8x34xf32>
    %c0_43 = arith.constant 0 : index
    %c0_44 = arith.constant 0 : index
    %216 = vector.load %arg4[%c0_43, %c0_44] : memref<34x64xf32, #tpu.memory_space<vmem>>, vector<34x64xf32>
    %cst_45 = arith.constant dense<0.000000e+00> : vector<8x64xf32>
    %217 = tpu.matmul %215, %216, %cst_45 {dimension_numbers = #tpu.dot_dimension_numbers<[1], [0], [0], [1], [0, 0, 1, 1], [], []>} : vector<8x34xf32>, vector<34x64xf32>, vector<8x64xf32> -> vector<8x64xf32>
    %218 = vector.broadcast %3 : vector<1x64xf32> to vector<8x64xf32>
    %219 = arith.addf %217, %218 : vector<8x64xf32>
    %cst_46 = arith.constant 0.000000e+00 : f32
    %220 = vector.broadcast %cst_46 : f32 to vector<8x64xf32>
    %221 = arith.maximumf %219, %220 : vector<8x64xf32>
    %c0_47 = arith.constant 0 : index
    %c0_48 = arith.constant 0 : index
    %222 = vector.load %arg6[%c0_47, %c0_48] : memref<8x2xf32, #tpu.memory_space<vmem>>, vector<8x2xf32>
    %223 = vector.extract_strided_slice %222 {offsets = [0, 0], sizes = [8, 1], strides = [1, 1]} : vector<8x2xf32> to vector<8x1xf32>
    %cst_49 = arith.constant 5.000000e-01 : f32
    %224 = vector.broadcast %cst_49 : f32 to vector<8x1xf32>
    %225 = arith.cmpf ogt, %223, %224 : vector<8x1xf32>
    %cst_50 = arith.constant -1.000000e+30 : f32
    %226 = vector.shape_cast %225 : vector<8x1xi1> to vector<8x1xi1>
    %227 = vector.broadcast %226 : vector<8x1xi1> to vector<8x64xi1>
    %228 = vector.broadcast %cst_50 : f32 to vector<8x64xf32>
    %229 = arith.select %227, %221, %228 : vector<8x64xi1>, vector<8x64xf32>
    %cst_51 = arith.constant dense<0xFF800000> : vector<64xf32>
    %230 = vector.multi_reduction <maximumf>, %229, %cst_51 [0] : vector<8x64xf32> to vector<64xf32>
    %231 = vector.shape_cast %230 : vector<64xf32> to vector<1x64xf32>
    %232 = vector.extract_strided_slice %222 {offsets = [0, 1], sizes = [8, 1], strides = [1, 1]} : vector<8x2xf32> to vector<8x1xf32>
    %cst_52 = arith.constant 5.000000e-01 : f32
    %233 = vector.broadcast %cst_52 : f32 to vector<8x1xf32>
    %234 = arith.cmpf ogt, %232, %233 : vector<8x1xf32>
    %cst_53 = arith.constant -1.000000e+30 : f32
    %235 = vector.shape_cast %234 : vector<8x1xi1> to vector<8x1xi1>
    %236 = vector.broadcast %235 : vector<8x1xi1> to vector<8x64xi1>
    %237 = vector.broadcast %cst_53 : f32 to vector<8x64xf32>
    %238 = arith.select %236, %221, %237 : vector<8x64xi1>, vector<8x64xf32>
    %cst_54 = arith.constant dense<0xFF800000> : vector<64xf32>
    %239 = vector.multi_reduction <maximumf>, %238, %cst_54 [0] : vector<8x64xf32> to vector<64xf32>
    %240 = vector.shape_cast %239 : vector<64xf32> to vector<1x64xf32>
    %241 = tpu.concatenate %231, %240 in 0 : vector<1x64xf32>, vector<1x64xf32> -> vector<2x64xf32>
    %cst_55 = arith.constant dense<0.000000e+00> : vector<8x64xf32>
    %242 = tpu.matmul %222, %241, %cst_55 {dimension_numbers = #tpu.dot_dimension_numbers<[1], [0], [0], [1], [0, 0, 1, 1], [], []>} : vector<8x2xf32>, vector<2x64xf32>, vector<8x64xf32> -> vector<8x64xf32>
    %c0_56 = arith.constant 0 : index
    %c0_57 = arith.constant 0 : index
    %243 = vector.load %arg5[%c0_56, %c0_57] : memref<64x32xf32, #tpu.memory_space<vmem>>, vector<64x32xf32>
    %cst_58 = arith.constant dense<0.000000e+00> : vector<8x32xf32>
    %244 = tpu.matmul %242, %243, %cst_58 {dimension_numbers = #tpu.dot_dimension_numbers<[1], [0], [0], [1], [0, 0, 1, 1], [], []>} : vector<8x64xf32>, vector<64x32xf32>, vector<8x32xf32> -> vector<8x32xf32>
    %245 = vector.broadcast %4 : vector<1x32xf32> to vector<8x32xf32>
    %246 = arith.addf %244, %245 : vector<8x32xf32>
    %247 = tpu.concatenate %212, %246 in 1 : vector<8x32xf32>, vector<8x32xf32> -> vector<8x64xf32>
    %248 = arith.mulf %247, %247 : vector<8x64xf32>
    %cst_59 = arith.constant dense<0.000000e+00> : vector<8xf32>
    %249 = vector.multi_reduction <add>, %248, %cst_59 [1] : vector<8x64xf32> to vector<8xf32>
    %250 = vector.shape_cast %249 : vector<8xf32> to vector<8x1xf32>
    %cst_60 = arith.constant 1.000000e-24 : f32
    %251 = vector.broadcast %cst_60 : f32 to vector<8x1xf32>
    %252 = arith.maximumf %250, %251 : vector<8x1xf32>
    %253 = math.rsqrt %252 : vector<8x1xf32>
    %254 = vector.broadcast %253 : vector<8x1xf32> to vector<8x64xf32>
    %255 = arith.mulf %247, %254 : vector<8x64xf32>
    %c0_61 = arith.constant 0 : index
    %c0_62 = arith.constant 0 : index
    %256 = vector.load %arg9[%c0_61, %c0_62] : memref<200x512xf32, #tpu.memory_space<vmem>>, vector<64x512xf32>
    %cst_63 = arith.constant dense<0.000000e+00> : vector<8x512xf32>
    %257 = tpu.matmul %255, %256, %cst_63 {dimension_numbers = #tpu.dot_dimension_numbers<[1], [0], [0], [1], [0, 0, 1, 1], [], []>} : vector<8x64xf32>, vector<64x512xf32>, vector<8x512xf32> -> vector<8x512xf32>
    %c0_64 = arith.constant 0 : index
    %c0_65 = arith.constant 0 : index
    %258 = vector.load %arg8[%c0_64, %c0_65] : memref<192x128xf32, #tpu.memory_space<vmem>>, vector<64x128xf32>
    %c64 = arith.constant 64 : index
    %c0_66 = arith.constant 0 : index
    %259 = vector.load %arg8[%c64, %c0_66] : memref<192x128xf32, #tpu.memory_space<vmem>>, vector<128x128xf32>
    %cst_67 = arith.constant dense<0.000000e+00> : vector<8x128xf32>
    %260 = tpu.matmul %247, %258, %cst_67 {dimension_numbers = #tpu.dot_dimension_numbers<[1], [0], [0], [1], [0, 0, 1, 1], [], []>} : vector<8x64xf32>, vector<64x128xf32>, vector<8x128xf32> -> vector<8x128xf32>
    %261 = vector.broadcast %5 : vector<1x128xf32> to vector<8x128xf32>
    %262 = arith.addf %260, %261 : vector<8x128xf32>
    %cst_68 = arith.constant 0.000000e+00 : f32
    %263 = vector.broadcast %cst_68 : f32 to vector<8x128xf32>
    %264 = arith.maximumf %262, %263 : vector<8x128xf32>
    %cst_69 = arith.constant dense<0.000000e+00> : vector<8x128xf32>
    %265 = tpu.matmul %264, %259, %cst_69 {dimension_numbers = #tpu.dot_dimension_numbers<[1], [0], [0], [1], [0, 0, 1, 1], [], []>} : vector<8x128xf32>, vector<128x128xf32>, vector<8x128xf32> -> vector<8x128xf32>
    %266 = vector.broadcast %6 : vector<1x128xf32> to vector<8x128xf32>
    %267 = arith.addf %265, %266 : vector<8x128xf32>
    %268 = arith.mulf %267, %267 : vector<8x128xf32>
    %cst_70 = arith.constant dense<0.000000e+00> : vector<8xf32>
    %269 = vector.multi_reduction <add>, %268, %cst_70 [1] : vector<8x128xf32> to vector<8xf32>
    %270 = vector.shape_cast %269 : vector<8xf32> to vector<8x1xf32>
    %cst_71 = arith.constant 1.000000e-24 : f32
    %271 = vector.broadcast %cst_71 : f32 to vector<8x1xf32>
    %272 = arith.maximumf %270, %271 : vector<8x1xf32>
    %273 = math.rsqrt %272 : vector<8x1xf32>
    %274 = vector.broadcast %273 : vector<8x1xf32> to vector<8x128xf32>
    %275 = arith.mulf %267, %274 : vector<8x128xf32>
    %c64_72 = arith.constant 64 : index
    %c0_73 = arith.constant 0 : index
    %276 = vector.load %arg9[%c64_72, %c0_73] : memref<200x512xf32, #tpu.memory_space<vmem>>, vector<128x512xf32>
    %cst_74 = arith.constant dense<0.000000e+00> : vector<8x512xf32>
    %277 = tpu.matmul %275, %276, %cst_74 {dimension_numbers = #tpu.dot_dimension_numbers<[1], [0], [0], [1], [0, 0, 1, 1], [], []>} : vector<8x128xf32>, vector<128x512xf32>, vector<8x512xf32> -> vector<8x512xf32>
    %c192 = arith.constant 192 : index
    %c0_75 = arith.constant 0 : index
    %278 = vector.load %arg9[%c192, %c0_75] : memref<200x512xf32, #tpu.memory_space<vmem>>, vector<2x512xf32>
    %c0_76 = arith.constant 0 : index
    %c2_77 = arith.constant 2 : index
    %279 = vector.load %arg7[%c0_76, %c2_77] : memref<8x4xf32, #tpu.memory_space<vmem>>, vector<8x1xf32>
    %c0_78 = arith.constant 0 : index
    %c3_79 = arith.constant 3 : index
    %280 = vector.load %arg7[%c0_78, %c3_79] : memref<8x4xf32, #tpu.memory_space<vmem>>, vector<8x1xf32>
    %281 = vector.extract_strided_slice %278 {offsets = [0, 0], sizes = [1, 512], strides = [1, 1]} : vector<2x512xf32> to vector<1x512xf32>
    %282 = vector.broadcast %279 : vector<8x1xf32> to vector<8x512xf32>
    %283 = vector.broadcast %281 : vector<1x512xf32> to vector<8x512xf32>
    %284 = arith.subf %282, %283 : vector<8x512xf32>
    %285 = vector.extract_strided_slice %278 {offsets = [1, 0], sizes = [1, 512], strides = [1, 1]} : vector<2x512xf32> to vector<1x512xf32>
    %286 = vector.broadcast %280 : vector<8x1xf32> to vector<8x512xf32>
    %287 = vector.broadcast %285 : vector<1x512xf32> to vector<8x512xf32>
    %288 = arith.subf %286, %287 : vector<8x512xf32>
    %289 = arith.mulf %284, %284 : vector<8x512xf32>
    %290 = arith.mulf %288, %288 : vector<8x512xf32>
    %291 = arith.addf %289, %290 : vector<8x512xf32>
    %292 = math.sqrt %291 : vector<8x512xf32>
    %c0_80 = arith.constant 0 : index
    %c0_81 = arith.constant 0 : index
    %c0_82 = arith.constant 0 : index
    %293 = vector.load %arg10[%c0_80, %c0_81, %c0_82] : memref<3x8x512xf32, #tpu.memory_space<vmem>>, vector<1x8x512xf32>
    %294 = vector.shape_cast %293 : vector<1x8x512xf32> to vector<8x512xf32>
    %295 = vector.shape_cast %257 : vector<8x512xf32> to vector<1x8x512xf32>
    tpu.vector_store %arg10[%c0_80, %c0_81, %c0_82], %295 {strides = array<i32>} : memref<3x8x512xf32, #tpu.memory_space<vmem>>, vector<1x8x512xf32>,
    %c1_83 = arith.constant 1 : index
    %c0_84 = arith.constant 0 : index
    %c0_85 = arith.constant 0 : index
    %296 = vector.load %arg10[%c1_83, %c0_84, %c0_85] : memref<3x8x512xf32, #tpu.memory_space<vmem>>, vector<1x8x512xf32>
    %297 = vector.shape_cast %296 : vector<1x8x512xf32> to vector<8x512xf32>
    %298 = vector.shape_cast %277 : vector<8x512xf32> to vector<1x8x512xf32>
    tpu.vector_store %arg10[%c1_83, %c0_84, %c0_85], %298 {strides = array<i32>} : memref<3x8x512xf32, #tpu.memory_space<vmem>>, vector<1x8x512xf32>,
    %c2_86 = arith.constant 2 : index
    %c0_87 = arith.constant 0 : index
    %c0_88 = arith.constant 0 : index
    %299 = vector.load %arg10[%c2_86, %c0_87, %c0_88] : memref<3x8x512xf32, #tpu.memory_space<vmem>>, vector<1x8x512xf32>
    %300 = vector.shape_cast %299 : vector<1x8x512xf32> to vector<8x512xf32>
    %301 = vector.shape_cast %292 : vector<8x512xf32> to vector<1x8x512xf32>
    tpu.vector_store %arg10[%c2_86, %c0_87, %c0_88], %301 {strides = array<i32>} : memref<3x8x512xf32, #tpu.memory_space<vmem>>, vector<1x8x512xf32>,
    return
  }
}

</mosaic_0001>

<bundles_post_ra>
// kernel: model_encdec_forward.1
= control target key start
LH: loop header
LB: loop body
LE: loop exit
PB: predicated region body
PF: predicated region fallthrough
CT: control target
= control target key end

     0   :  { %15 = vsyncpa [#allocation3], 0  ;;  %s1670_s16 = smov [#allocation2]   ;;  %s1671_s18 = smov 512   ;;  %s2396_s0 = inlined_call_operand.vmem [shape: f32[64,12], index: 0, kind: input, shape index: {}]   ;;  %s2397_s1 = inlined_call_operand.vmem [shape: f32[12,32], index: 1, kind: input, shape index: {}]   ;;  %s2398_s2 = inlined_call_operand.vmem [shape: f32[96,192], index: 2, kind: input, shape index: {}]   ;;  %s2399_s3 = inlined_call_operand.vmem [shape: f32[8,192], index: 3, kind: input, shape index: {}]   ;;  %s2400_s4 = inlined_call_operand.vmem [shape: f32[34,64], index: 4, kind: input, shape index: {}]   ;;  %s2401_s5 = inlined_call_operand.vmem [shape: f32[64,32], index: 5, kind: input, shape index: {}]   ;;  %s2402_s6 = inlined_call_operand.vmem [shape: f32[8,2], index: 6, kind: input, shape index: {}]   ;;  %s2403_s7 = inlined_call_operand.vmem [shape: f32[8,4], index: 7, kind: input, shape index: {}]   ;;  %s2404_s8 = inlined_call_operand.vmem [shape: f32[192,128], index: 8, kind: input, shape index: {}]   ;;  %s2405_s9 = inlined_call_operand.hbm [shape: f32[200,512], index: 9, kind: input, shape index: {}]   ;;  %s2406_s10 = inlined_call_operand.vmem [shape: f32[3,8,512], index: 10, kind: output, shape index: {}]  }
   0x1   :  { %s38_s15 = sshll.u32 %s2405_s9, 4  ;;  %s40_s17 = sshll.u32 %s1670_s16, 4  ;;  %s39_s15 = int_to_ptr.hbm [resolvable:$true] %s38_s15  ;;  %s41_s17 = int_to_ptr.vmem [resolvable:$true] %s40_s17 }
   0x2   :  { %s1672_s19 = smov 32  }
   0x3   :  { %46 = dma.hbm_to_vmem [thread:$0]  %s39_s15, 12800, %s41_s17, [#allocation3], %s1671_s18, %s1671_s18, %s1672_s19  }
   0x4   :  { %1668 = dma.done.wait [#allocation3], 12800  }
   0x5   :  { %1669 = vsyncadd [#allocation3], 4294954496  ;;  %vm95_vm0 = vcmask 1043456   ;;  %v69_v0 = vld [vmem:[%s2397_s1 + $0x8] sm:$0xf]  ;;  %v68_v1 = vld [vmem:[%s2397_s1] sm:$0xff] }
   0x6   :  { %1502 = vmatpush.msk.msra.mxu0 %vm95_vm0, %v69_v0  ;;  %v60_v2 = vld [vmem:[%s2396_s0] sm:$0xff]  ;;  %vm70_vm1 = vcmask 97280   ;;  %v61_v3 = vld [vmem:[%s2396_s0 + $0x8] sm:$0xff]  ;;  %v62_v4 = vld [vmem:[%s2396_s0 + $0x10] sm:$0xff]  ;;  %vm177_vm2 = vcmask 261120   ;;  %v1673_v59 = vmov 0.0  }
   0x7   :  { %v63_v5 = vld [vmem:[%s2396_s0 + $0x18] sm:$0xff]  ;;  %v154_v6 = vld [vmem:[%s2398_s2 + $0x30] sm:$0xff]  ;;  %v64_v8 = vld [vmem:[%s2396_s0 + $0x20] sm:$0xff]  ;;  %s1674_s27 = smov 64   ;;  %vm289_vm7 = vcmask 523264  }
   0x8   :  { %114 = vmatpush.msra.mxu0 %v68_v1  ;;  %v155_v7 = vld [vmem:[%s2398_s2 + $0x38] sm:$0xff]  ;;  %214 = vmatpush.msra.mxu1 %v154_v6  ;;  %v65_v9 = vld [vmem:[%s2396_s0 + $0x28] sm:$0xff]  ;;  %v66_v10 = vld [vmem:[%s2396_s0 + $0x30] sm:$0xff] }
   0x9   :  { %1503 = vmatmul.msk.f32.vlgmr.msra.gmra.mxu0 %vm70_vm1, %v60_v2  ;;  %255 = vmatpush.msra.mxu2 %v155_v7  ;;  %v67_v11 = vld [vmem:[%s2396_s0 + $0x38] sm:$0xff]  ;;  %v152_v12 = vld [vmem:[%s2398_s2 + $0x20] sm:$0xff]  ;;  %v153_v13 = vld [vmem:[%s2398_s2 + $0x28] sm:$0xff] }
   0xa   :  { %1567 = vmatpush.msra.mxu3 %v154_v6  ;;  %215 = vmatpush.msra.mxu1 %v152_v12  ;;  %v150_v14 = vld [vmem:[%s2398_s2 + $0x10] sm:$0xff]  ;;  %v151_v15 = vld [vmem:[%s2398_s2 + $0x18] sm:$0xff]  ;;  %v148_v16 = vld [vmem:[%s2398_s2] sm:$0xff] }
   0xb   :  { %256 = vmatpush.msra.mxu2 %v153_v13  ;;  %v149_v17 = vld [vmem:[%s2398_s2 + $0x8] sm:$0xff]  ;;  %v1803_v18 = vld [vmem:[%s2399_s3] ss:$0 sm:$0xff]  ;;  %v1817_v28 = vld [vmem:[%s2398_s2 + $0xb0] sm:$0xff] }
   0xc   :  { %1568 = vmatpush.msra.mxu3 %v152_v12  ;;  %216 = vmatpush.msra.mxu1 %v150_v14  ;;  %v1824_v29 = vld [vmem:[%s2398_s2 + $0xa0] sm:$0xff]  ;;  %v1833_v32 = vld [vmem:[%s2398_s2 + $0x90] sm:$0xff]  ;;  %v1885_v42 = vld [vmem:[%s2398_s2 + $0xb8] sm:$0xff] }
   0xd   :  { %257 = vmatpush.msra.mxu2 %v151_v15  ;;  %453 = vmatpush.msrb.mxu0 %v1817_v28  ;;  %v1841_v34 = vld [vmem:[%s2398_s2 + $0x80] sm:$0xff]  ;;  %v1851_v35 = vld [vmem:[%s2398_s2 + $0x70] sm:$0xff]  ;;  %v1892_v43 = vld [vmem:[%s2398_s2 + $0xa8] sm:$0xff] }
   0xe   :  { %1569 = vmatpush.msra.mxu3 %v150_v14  ;;  %217 = vmatpush.msra.mxu1 %v148_v16  ;;  %v1856_v36 = vld [vmem:[%s2398_s2 + $0x60] sm:$0xff]  ;;  %v1863_v37 = vld [vmem:[%s2398_s2 + $0x50] sm:$0xff]  ;;  %v1901_v46 = vld [vmem:[%s2398_s2 + $0x98] sm:$0xff] }
   0xf   :  { %258 = vmatpush.msra.mxu2 %v149_v17  ;;  %454 = vmatpush.msrb.mxu0 %v1824_v29  ;;  %v1872_v40 = vld [vmem:[%s2398_s2 + $0x40] sm:$0xff]  ;;  %v1909_v48 = vld [vmem:[%s2398_s2 + $0x88] sm:$0xff]  ;;  %v1919_v49 = vld [vmem:[%s2398_s2 + $0x78] sm:$0xff] }
  0x10   :  { %1570 = vmatpush.msra.mxu3 %v148_v16  ;;  %473 = vmatpush.msrb.mxu1 %v1885_v42  ;;  %v1926_v50 = vld [vmem:[%s2398_s2 + $0x68] sm:$0xff]  ;;  %v1935_v53 = vld [vmem:[%s2398_s2 + $0x58] sm:$0xff] }
  0x11   :  { %1504 = vmatmul.msk.f32.gmra.mxu0 %vm70_vm1, %v61_v3  ;;  %529 = vmatpush.msrb.mxu2 %v1817_v28  ;;  %v1943_v55 = vld [vmem:[%s2398_s2 + $0x48] sm:$0xff] }
  0x12   :  { %301 = vmatpush.msrb.mxu3 %v1817_v28  ;;  %455 = vmatpush.msrb.mxu0 %v1833_v32  ;;  %v1500_v1 = vld [vmem:[%s2399_s3 + $0x1] ss:$8 sm:$0x3] }
  0x13   :  { %530 = vmatpush.msrb.mxu2 %v1824_v29  ;;  %474 = vmatpush.msrb.mxu1 %v1892_v43  ;;  %v2000_v3 = vperm.slane %v1500_v1, 0  ;;  %v2005_v6 = vperm.slane %v1500_v1, 1 }
  0x14   :  { %302 = vmatpush.msrb.mxu3 %v1824_v29  ;;  %456 = vmatpush.msrb.mxu0 %v1841_v34 }
  0x15   :  { %531 = vmatpush.msrb.mxu2 %v1833_v32  ;;  %475 = vmatpush.msrb.mxu1 %v1901_v46 }
  0x16   :  { %303 = vmatpush.msrb.mxu3 %v1833_v32  ;;  %457 = vmatpush.msrb.mxu0 %v1851_v35 }
  0x17   :  { %532 = vmatpush.msrb.mxu2 %v1841_v34  ;;  %476 = vmatpush.msrb.mxu1 %v1909_v48 }
  0x18   :  { %304 = vmatpush.msrb.mxu3 %v1841_v34  ;;  %458 = vmatpush.msrb.mxu0 %v1856_v36 }
  0x19   :  { %1505 = vmatmul.msk.f32.gmra.mxu0 %vm70_vm1, %v62_v4  ;;  %533 = vmatpush.msrb.mxu2 %v1851_v35 }
  0x1a   :  { %305 = vmatpush.msrb.mxu3 %v1851_v35  ;;  %459 = vmatpush.msrb.mxu0 %v1863_v37 }
  0x1b   :  { %534 = vmatpush.msrb.mxu2 %v1856_v36  ;;  %477 = vmatpush.msrb.mxu1 %v1919_v49 }
  0x1c   :  { %306 = vmatpush.msrb.mxu3 %v1856_v36  ;;  %460 = vmatpush.msrb.mxu0 %v1872_v40 }
  0x1d   :  { %535 = vmatpush.msrb.mxu2 %v1863_v37  ;;  %478 = vmatpush.msrb.mxu1 %v1926_v50 }
  0x1e   :  { %307 = vmatpush.msrb.mxu3 %v1863_v37  ;;  %605 = vmatpush.msra.mxu0 %v1817_v28 }
  0x1f   :  { %536 = vmatpush.msrb.mxu2 %v1872_v40  ;;  %479 = vmatpush.msrb.mxu1 %v1935_v53 }
  0x20   :  { %308 = vmatpush.msrb.mxu3 %v1872_v40  ;;  %606 = vmatpush.msra.mxu0 %v1824_v29 }
  0x21   :  { %1506 = vmatmul.msk.f32.gmra.mxu0 %vm70_vm1, %v63_v5  ;;  %480 = vmatpush.msrb.mxu1 %v1943_v55 }
  0x22   :  { %607 = vmatpush.msra.mxu0 %v1833_v32 }
  0x24   :  { %608 = vmatpush.msra.mxu0 %v1841_v34 }
  0x26   :  { %609 = vmatpush.msra.mxu0 %v1851_v35 }
  0x28   :  { %610 = vmatpush.msra.mxu0 %v1856_v36 }
  0x29   :  { %1507 = vmatmul.msk.f32.gmra.mxu0 %vm70_vm1, %v64_v8 }
  0x2a   :  { %611 = vmatpush.msra.mxu0 %v1863_v37 }
  0x2c   :  { %612 = vmatpush.msra.mxu0 %v1872_v40 }
  0x31   :  { %1508 = vmatmul.msk.f32.gmra.mxu0 %vm70_vm1, %v65_v9 }
  0x39   :  { %1509 = vmatmul.msk.f32.gmra.mxu0 %vm70_vm1, %v66_v10 }
  0x41   :  { %1510 = vmatmul.msk.f32.gmra.mxu0 %vm70_vm1, %v67_v11 }
  0x86   :  { %v116_v19 = vpop.f32.mrf.mxu0 }
  0x87   :  { %v117_v20 = vadd.f32 %v116_v19, %v1803_v18 }
  0x89   :  { %v140_v21 = vmax.f32 %v117_v20, 0.0 }
  0x8b   :  { %1511 = vmatmul.msk.f32.vlgmr.msra.gmra.mxu1 %vm177_vm2, %v140_v21  ;;  %1519 = vmatmul.msk.f32.vlgmr.msra.gmra.mxu2 %vm177_vm2, %v140_v21  ;;  %v1501_v21 = vld [vmem:[%s2399_s3 + $0x2] ss:$8 sm:$0x3] }
  0x8c   :  { %681 = vmatpush.msra.mxu2 %v1817_v28  ;;  %625 = vmatpush.msra.mxu1 %v1885_v42 }
  0x8e   :  { %v119_v22 = vpop.f32.mrf.mxu0  ;;  %682 = vmatpush.msra.mxu2 %v1824_v29  ;;  %626 = vmatpush.msra.mxu1 %v1892_v43 }
  0x8f   :  { %v120_v23 = vadd.f32 %v119_v22, %v1803_v18  ;;  %v2031_v22 = vperm.slane %v1501_v21, 0 }
  0x90   :  { %683 = vmatpush.msra.mxu2 %v1833_v32  ;;  %627 = vmatpush.msra.mxu1 %v1901_v46 }
  0x91   :  { %v141_v24 = vmax.f32 %v120_v23, 0.0 }
  0x92   :  { %684 = vmatpush.msra.mxu2 %v1841_v34  ;;  %628 = vmatpush.msra.mxu1 %v1909_v48 }
  0x93   :  { %1512 = vmatmul.msk.f32.gmra.mxu1 %vm177_vm2, %v141_v24  ;;  %1520 = vmatmul.msk.f32.gmra.mxu2 %vm177_vm2, %v141_v24 }
  0x94   :  { %685 = vmatpush.msra.mxu2 %v1851_v35  ;;  %629 = vmatpush.msra.mxu1 %v1919_v49 }
  0x96   :  { %v122_v25 = vpop.f32.mrf.mxu0  ;;  %686 = vmatpush.msra.mxu2 %v1856_v36  ;;  %630 = vmatpush.msra.mxu1 %v1926_v50 }
  0x97   :  { %v123_v26 = vadd.f32 %v122_v25, %v1803_v18 }
  0x98   :  { %687 = vmatpush.msra.mxu2 %v1863_v37  ;;  %631 = vmatpush.msra.mxu1 %v1935_v53 }
  0x99   :  { %v142_v27 = vmax.f32 %v123_v26, 0.0 }
  0x9a   :  { %688 = vmatpush.msra.mxu2 %v1872_v40  ;;  %632 = vmatpush.msra.mxu1 %v1943_v55 }
  0x9b   :  { %1513 = vmatmul.msk.f32.gmra.mxu1 %vm177_vm2, %v142_v27  ;;  %1521 = vmatmul.msk.f32.gmra.mxu2 %vm177_vm2, %v142_v27 }
  0x9e   :  { %v125_v30 = vpop.f32.mrf.mxu0 }
  0x9f   :  { %v126_v31 = vadd.f32 %v125_v30, %v1803_v18 }
  0xa1   :  { %v143_v33 = vmax.f32 %v126_v31, 0.0 }
  0xa3   :  { %1514 = vmatmul.msk.f32.gmra.mxu1 %vm177_vm2, %v143_v33  ;;  %1522 = vmatmul.msk.f32.gmra.mxu2 %vm177_vm2, %v143_v33 }
  0xa6   :  { %v128_v38 = vpop.f32.mrf.mxu0 }
  0xa7   :  { %v129_v39 = vadd.f32 %v128_v38, %v1803_v18 }
  0xa9   :  { %v144_v41 = vmax.f32 %v129_v39, 0.0  ;;  %v2035_v39 = vperm.slane %v1501_v21, 1 }
  0xab   :  { %1515 = vmatmul.msk.f32.gmra.mxu1 %vm177_vm2, %v144_v41  ;;  %1523 = vmatmul.msk.f32.gmra.mxu2 %vm177_vm2, %v144_v41 }
  0xae   :  { %v131_v44 = vpop.f32.mrf.mxu0 }
  0xaf   :  { %v132_v45 = vadd.f32 %v131_v44, %v1803_v18 }
  0xb1   :  { %v145_v47 = vmax.f32 %v132_v45, 0.0 }
  0xb3   :  { %1516 = vmatmul.msk.f32.gmra.mxu1 %vm177_vm2, %v145_v47  ;;  %1524 = vmatmul.msk.f32.gmra.mxu2 %vm177_vm2, %v145_v47 }
  0xb6   :  { %v134_v51 = vpop.f32.mrf.mxu0 }
  0xb7   :  { %v135_v52 = vadd.f32 %v134_v51, %v1803_v18 }
  0xb9   :  { %v146_v54 = vmax.f32 %v135_v52, 0.0 }
  0xbb   :  { %1517 = vmatmul.msk.f32.vlgmr.msra.gmra.mxu3 %vm177_vm2, %v146_v54  ;;  %1525 = vmatmul.msk.f32.gmra.mxu2 %vm177_vm2, %v146_v54 }
  0xbc   :  { %321 = vmatpush.msra.mxu3 %v1885_v42 }
  0xbe   :  { %v137_v56 = vpop.f32.mrf.mxu0  ;;  %322 = vmatpush.msra.mxu3 %v1892_v43 }
  0xbf   :  { %v138_v57 = vadd.f32 %v137_v56, %v1803_v18 }
  0xc0   :  { %323 = vmatpush.msra.mxu3 %v1901_v46 }
  0xc1   :  { %v147_v58 = vmax.f32 %v138_v57, 0.0 }
  0xc2   :  { %324 = vmatpush.msra.mxu3 %v1909_v48 }
  0xc3   :  { %1518 = vmatmul.msk.f32.gmra.mxu3 %vm177_vm2, %v147_v58  ;;  %1526 = vmatmul.msk.f32.gmra.mxu2 %vm177_vm2, %v147_v58 }
  0xc4   :  { %325 = vmatpush.msra.mxu3 %v1919_v49 }
  0xc6   :  { %326 = vmatpush.msra.mxu3 %v1926_v50 }
  0xc8   :  { %327 = vmatpush.msra.mxu3 %v1935_v53 }
  0xca   :  { %328 = vmatpush.msra.mxu3 %v1943_v55 }
  0xcb   :  { %309 = vmatmul.f32.vlgmr.msrb.gmra.mxu3 %v1673_v59 }
  0xcc   :  { %377 = vmatpush.msrb.mxu3 %v1817_v28 }
  0xce   :  { %378 = vmatpush.msrb.mxu3 %v1824_v29 }
  0xd0   :  { %379 = vmatpush.msrb.mxu3 %v1833_v32 }
  0xd2   :  { %380 = vmatpush.msrb.mxu3 %v1841_v34 }
  0xd3   :  { %329 = vmatmul.f32.vlgmr.msra.gmra.mxu3 %v1673_v59 }
  0xd4   :  { %381 = vmatpush.msrb.mxu3 %v1851_v35 }
  0xd6   :  { %382 = vmatpush.msrb.mxu3 %v1856_v36 }
  0xd8   :  { %383 = vmatpush.msrb.mxu3 %v1863_v37 }
  0xda   :  { %384 = vmatpush.msrb.mxu3 %v1872_v40 }
  0xdc   :  { %397 = vmatpush.msra.mxu3 %v1885_v42 }
  0xde   :  { %398 = vmatpush.msra.mxu3 %v1892_v43 }
  0xe0   :  { %399 = vmatpush.msra.mxu3 %v1901_v46 }
  0xe2   :  { %400 = vmatpush.msra.mxu3 %v1909_v48 }
  0xe4   :  { %401 = vmatpush.msra.mxu3 %v1919_v49 }
  0xe6   :  { %402 = vmatpush.msra.mxu3 %v1926_v50 }
  0xe8   :  { %403 = vmatpush.msra.mxu3 %v1935_v53 }
  0xea   :  { %404 = vmatpush.msra.mxu3 %v1943_v55 }
 0x108   :  { %v219_v60 = vpop.f32.mrf.mxu1 }
 0x109   :  { %v220_v24 = vadd.f32 %v219_v60, %v2000_v3 }
 0x10e   :  { %v260_v61 = vpop.f32.mrf.mxu2 }
 0x10f   :  { %v261_v59 = vadd.f32 %v260_v61, %v2005_v6 }
 0x110   :  { %v1989_v62 = vpop.f32.mrf.mxu1 }
 0x116   :  { %v1991_v63 = vpop.f32.mrf.mxu2 }
 0x118   :  { %v1993_v0 = vpop.f32.mrf.mxu1 }
 0x11e   :  { %v1998_v2 = vpop.f32.mrf.mxu2 }
 0x120   :  { %v228_v4 = vpop.f32.mrf.mxu1 }
 0x121   :  { %v2003_v5 = vadd.f32 %v228_v4, %v2000_v3 }
 0x126   :  { %v269_v7 = vpop.f32.mrf.mxu2 }
 0x127   :  { %v2008_v8 = vadd.f32 %v269_v7, %v2005_v6 }
 0x128   :  { %v231_v9 = vpop.f32.mrf.mxu1 }
 0x129   :  { %v2011_v10 = vadd.f32 %v231_v9, %v2000_v3 }
 0x12e   :  { %v272_v11 = vpop.f32.mrf.mxu2 }
 0x12f   :  { %v2014_v12 = vadd.f32 %v272_v11, %v2005_v6 }
 0x136   :  { %v275_v13 = vpop.f32.mrf.mxu2 }
 0x137   :  { %v2017_v14 = vadd.f32 %v275_v13, %v2005_v6 }
 0x13e   :  { %v237_v15 = vpop.f32.mrf.mxu3  ;;  %v278_v16 = vpop.f32.mrf.mxu2 }
 0x13f   :  { %v2020_v17 = vadd.f32 %v237_v15, %v2000_v3  ;;  %v2023_v18 = vadd.f32 %v278_v16, %v2005_v6 }
 0x146   :  { %v240_v19 = vpop.f32.mrf.mxu3 }
 0x147   :  { %v2026_v20 = vadd.f32 %v240_v19, %v2000_v3  ;;  %v223_v19 = vadd.f32 %v1989_v62, %v2000_v3 }
 0x14e   :  { %v310_v23 = vpop.f32.mrf.mxu3 }
 0x14f   :  { %v311_v25 = vadd.f32 %v310_v23, %v2031_v22 }
 0x151   :  { %v333_v26 = vadd.f32 %v311_v25, %v220_v24 }
 0x153   :  { %v1527_v27 = vmul.f32 -1.442695, %v333_v26 }
 0x155   :  { %1584 = vpow2.f32 %v1527_v27 }
 0x156   :  { %v330_v44 = vpop.f32.mrf.mxu3 }
 0x157   :  { %v331_v52 = vadd.f32 %v330_v44, %v2035_v39 }
 0x15b   :  { %v1585_v30 = vpop.eup %1584 }
 0x15c   :  { %v337_v31 = vadd.f32 1.0, %v1585_v30 }
 0x15e   :  { %1586 = vrcp.f32 %v337_v31  ;;  %v349_v45 = vand.u32 2147483648, %v337_v31  ;;  %v347_v51 = vand.u32 2147483647, %v337_v31  ;;  %vm343_vm4 = vweird.f32 %v337_v31 }
 0x160   :  { %v350_v56 = vor.u32 1.1754944e-38, %v349_v45  ;;  %vm348_vm6 = vcmp.eq.f32.partialorder %v347_v51, 8.507059e+37 }
 0x164   :  { %v1587_v33 = vpop.eup %1586 }
 0x165   :  { %v339_v38 = vmul.f32 %v1587_v33, %v337_v31  ;;  %vm344_vm3 = vweird.f32 %v1587_v33 }
 0x166   :  { %vm345_vm5 = vmor %vm343_vm4, %vm344_vm3 }
 0x167   :  { %v340_v41 = vsub.f32 1.0, %v339_v38 }
 0x169   :  { %v341_v47 = vmul.f32 %v1587_v33, %v340_v41 }
 0x16b   :  { %v342_v54 = vadd.f32 %v1587_v33, %v341_v47 }
 0x16d   :  { %v346_v57 = vsel %vm345_vm5, %v1587_v33, %v342_v54  ;;  %v264_v54 = vadd.f32 %v1991_v63, %v2005_v6 }
 0x16e   :  { %v351_v58 = vsel %vm348_vm6, %v350_v56, %v346_v57 }
 0x16f   :  { %v353_v60 = vmul.f32 %v351_v58, %v331_v52  ;;  %v356_v7 = vsub.f32 1.0, %v351_v58  ;;  %v362_v11 = vmul.f32 0.0, %v351_v58 }
 0x171   :  { %v354_v1 = vadd.f32 %v353_v60, %v261_v59 }
 0x173   :  { %1588 = vtanh.f32 %v354_v1 }
 0x179   :  { %v1589_v4 = vpop.eup %1588 }
 0x17a   :  { %358 = vrot.lane.b32.xlu0 %v1589_v4, %s1674_s27 }
 0x1ec   :  { %v359_v9 = vpop.permute.xlu0 %358 }
 0x1ed   :  { %v361_v13 = vmul.f32 %v359_v9, %v356_v7 }
 0x1ef   :  { %v363_v15 = vadd.f32 %v362_v11, %v361_v13  ;;  %v226_v11 = vadd.f32 %v1993_v0, %v2000_v3 }
 0x1f1   :  { %365 = vrot.lane.b32.xlu0 %v363_v15, %s1674_s27 }
 0x263   :  { %v366_v16 = vpop.permute.xlu0 %365 }
 0x264   :  { %1528 = vmatmul.msk.f32.vlgmr.msrb.gmra.mxu3 %vm289_vm7, %v366_v16 }
 0x265   :  { %549 = vmatpush.msrb.mxu3 %v1885_v42 }
 0x267   :  { %550 = vmatpush.msrb.mxu3 %v1892_v43 }
 0x269   :  { %551 = vmatpush.msrb.mxu3 %v1901_v46 }
 0x26b   :  { %552 = vmatpush.msrb.mxu3 %v1909_v48 }
 0x26c   :  { %1529 = vmatmul.msk.f32.vlgmr.msra.gmra.mxu3 %vm289_vm7, %v366_v16 }
 0x26d   :  { %553 = vmatpush.msrb.mxu3 %v1919_v49 }
 0x26f   :  { %554 = vmatpush.msrb.mxu3 %v1926_v50 }
 0x271   :  { %555 = vmatpush.msrb.mxu3 %v1935_v53 }
 0x273   :  { %556 = vmatpush.msrb.mxu3 %v1943_v55 }
 0x275   :  { %701 = vmatpush.msra.mxu3 %v1885_v42 }
 0x277   :  { %702 = vmatpush.msra.mxu3 %v1892_v43 }
 0x279   :  { %703 = vmatpush.msra.mxu3 %v1901_v46 }
 0x27b   :  { %704 = vmatpush.msra.mxu3 %v1909_v48 }
 0x27d   :  { %705 = vmatpush.msra.mxu3 %v1919_v49 }
 0x27f   :  { %706 = vmatpush.msra.mxu3 %v1926_v50 }
 0x281   :  { %707 = vmatpush.msra.mxu3 %v1935_v53 }
 0x283   :  { %708 = vmatpush.msra.mxu3 %v1943_v55 }
 0x2e7   :  { %v386_v61 = vpop.f32.mrf.mxu3 }
 0x2e8   :  { %v387_v21 = vadd.f32 %v386_v61, %v2031_v22 }
 0x2ea   :  { %v409_v23 = vadd.f32 %v387_v21, %v223_v19  ;;  %v2088_v21 = vpop.f32.mrf.mxu1 }
 0x2ec   :  { %v1530_v24 = vmul.f32 -1.442695, %v409_v23 }
 0x2ee   :  { %1590 = vpow2.f32 %v1530_v24 }
 0x2ef   :  { %v406_v44 = vpop.f32.mrf.mxu3 }
 0x2f0   :  { %v407_v47 = vadd.f32 %v406_v44, %v2035_v39 }
 0x2f4   :  { %v1591_v25 = vpop.eup %1590 }
 0x2f5   :  { %v413_v26 = vadd.f32 1.0, %v1591_v25 }
 0x2f7   :  { %1592 = vrcp.f32 %v413_v26  ;;  %v425_v33 = vand.u32 2147483648, %v413_v26  ;;  %v423_v41 = vand.u32 2147483647, %v413_v26  ;;  %vm419_vm9 = vweird.f32 %v413_v26 }
 0x2f9   :  { %v426_v62 = vor.u32 1.1754944e-38, %v425_v33  ;;  %vm424_vm11 = vcmp.eq.f32.partialorder %v423_v41, 8.507059e+37 }
 0x2fd   :  { %v1593_v27 = vpop.eup %1592 }
 0x2fe   :  { %v415_v30 = vmul.f32 %v1593_v27, %v413_v26  ;;  %vm420_vm8 = vweird.f32 %v1593_v27 }
 0x2ff   :  { %vm421_vm10 = vmor %vm419_vm9, %vm420_vm8 }
 0x300   :  { %v416_v31 = vsub.f32 1.0, %v415_v30 }
 0x302   :  { %v417_v38 = vmul.f32 %v1593_v27, %v416_v31 }
 0x304   :  { %v418_v45 = vadd.f32 %v1593_v27, %v417_v38 }
 0x306   :  { %v422_v51 = vsel %vm421_vm10, %v1593_v27, %v418_v45  ;;  %v267_v45 = vadd.f32 %v1998_v2, %v2005_v6 }
 0x307   :  { %v427_v52 = vsel %vm424_vm11, %v426_v62, %v422_v51 }
 0x308   :  { %v429_v56 = vmul.f32 %v427_v52, %v407_v47  ;;  %v432_v59 = vsub.f32 1.0, %v427_v52  ;;  %v438_v1 = vmul.f32 %v427_v52, %v363_v15 }
 0x30a   :  { %v430_v57 = vadd.f32 %v429_v56, %v264_v54 }
 0x30c   :  { %1594 = vtanh.f32 %v430_v57 }
 0x312   :  { %v1595_v58 = vpop.eup %1594 }
 0x313   :  { %434 = vrot.lane.b32.xlu1 %v1595_v58, %s1674_s27 }
 0x385   :  { %v435_v60 = vpop.permute.xlu1 %434 }
 0x386   :  { %v437_v4 = vmul.f32 %v435_v60, %v432_v59 }
 0x388   :  { %v439_v7 = vadd.f32 %v438_v1, %v437_v4 }
 0x38a   :  { %441 = vrot.lane.b32.xlu1 %v439_v7, %s1674_s27 }
 0x3fc   :  { %v442_v9 = vpop.permute.xlu1 %441 }
 0x3fd   :  { %1531 = vmatmul.msk.f32.vlgmr.msrb.gmra.mxu0 %vm289_vm7, %v442_v9  ;;  %1532 = vmatmul.msk.f32.vlgmr.msrb.gmra.mxu1 %vm289_vm7, %v442_v9 }
 0x3fe   :  { %757 = vmatpush.msrb.mxu0 %v1817_v28  ;;  %777 = vmatpush.msrb.mxu1 %v1885_v42 }
 0x400   :  { %758 = vmatpush.msrb.mxu0 %v1824_v29  ;;  %778 = vmatpush.msrb.mxu1 %v1892_v43 }
 0x402   :  { %759 = vmatpush.msrb.mxu0 %v1833_v32  ;;  %779 = vmatpush.msrb.mxu1 %v1901_v46 }
 0x404   :  { %760 = vmatpush.msrb.mxu0 %v1841_v34  ;;  %780 = vmatpush.msrb.mxu1 %v1909_v48 }
 0x406   :  { %761 = vmatpush.msrb.mxu0 %v1851_v35  ;;  %781 = vmatpush.msrb.mxu1 %v1919_v49 }
 0x408   :  { %762 = vmatpush.msrb.mxu0 %v1856_v36  ;;  %782 = vmatpush.msrb.mxu1 %v1926_v50 }
 0x40a   :  { %763 = vmatpush.msrb.mxu0 %v1863_v37  ;;  %783 = vmatpush.msrb.mxu1 %v1935_v53 }
 0x40c   :  { %764 = vmatpush.msrb.mxu0 %v1872_v40  ;;  %784 = vmatpush.msrb.mxu1 %v1943_v55 }
 0x47a   :  { %v462_v63 = vpop.f32.mrf.mxu0  ;;  %v482_v31 = vpop.f32.mrf.mxu1 }
 0x47b   :  { %v463_v13 = vadd.f32 %v462_v63, %v2031_v22  ;;  %v483_v38 = vadd.f32 %v482_v31, %v2035_v39 }
 0x47d   :  { %v485_v15 = vadd.f32 %v463_v13, %v226_v11 }
 0x47f   :  { %v1533_v16 = vmul.f32 -1.442695, %v485_v15 }
 0x481   :  { %1596 = vpow2.f32 %v1533_v16 }
 0x487   :  { %v1597_v61 = vpop.eup %1596 }
 0x488   :  { %v489_v19 = vadd.f32 1.0, %v1597_v61 }
 0x48a   :  { %1598 = vrcp.f32 %v489_v19  ;;  %v501_v26 = vand.u32 2147483648, %v489_v19  ;;  %v499_v30 = vand.u32 2147483647, %v489_v19  ;;  %vm495_vm13 = vweird.f32 %v489_v19 }
 0x48c   :  { %v502_v0 = vor.u32 1.1754944e-38, %v501_v26  ;;  %vm500_vm15 = vcmp.eq.f32.partialorder %v499_v30, 8.507059e+37 }
 0x490   :  { %v1599_v23 = vpop.eup %1598 }
 0x491   :  { %v491_v24 = vmul.f32 %v1599_v23, %v489_v19  ;;  %vm496_vm12 = vweird.f32 %v1599_v23 }
 0x492   :  { %vm497_vm14 = vmor %vm495_vm13, %vm496_vm12 }
 0x493   :  { %v492_v25 = vsub.f32 1.0, %v491_v24 }
 0x495   :  { %v493_v27 = vmul.f32 %v1599_v23, %v492_v25 }
 0x497   :  { %v494_v33 = vadd.f32 %v1599_v23, %v493_v27 }
 0x499   :  { %v498_v41 = vsel %vm497_vm14, %v1599_v23, %v494_v33 }
 0x49a   :  { %v503_v44 = vsel %vm500_vm15, %v502_v0, %v498_v41 }
 0x49b   :  { %v505_v62 = vmul.f32 %v503_v44, %v483_v38  ;;  %v508_v52 = vsub.f32 1.0, %v503_v44  ;;  %v514_v56 = vmul.f32 %v503_v44, %v439_v7 }
 0x49d   :  { %v506_v47 = vadd.f32 %v505_v62, %v267_v45 }
 0x49f   :  { %1600 = vtanh.f32 %v506_v47 }
 0x4a5   :  { %v1601_v51 = vpop.eup %1600 }
 0x4a6   :  { %510 = vrot.lane.b32.xlu2 %v1601_v51, %s1674_s27 }
 0x500   :  { %v511_v54 = vpop.permute.xlu2 %510 }
 0x501   :  { %v513_v57 = vmul.f32 %v511_v54, %v508_v52 }
 0x503   :  { %v515_v58 = vadd.f32 %v514_v56, %v513_v57 }
 0x505   :  { %517 = vrot.lane.b32.xlu2 %v515_v58, %s1674_s27 }
 0x55f   :  { %v518_v59 = vpop.permute.xlu2 %517 }
 0x560   :  { %1534 = vmatmul.msk.f32.vlgmr.msrb.gmra.mxu2 %vm289_vm7, %v518_v59  ;;  %1535 = vmatmul.msk.f32.vlgmr.msrb.gmra.mxu3 %vm289_vm7, %v518_v59 }
 0x561   :  { %833 = vmatpush.msrb.mxu2 %v1817_v28  ;;  %853 = vmatpush.msrb.mxu3 %v1885_v42  ;;  %v2113_v28 = vpop.f32.mrf.mxu2 }
 0x563   :  { %834 = vmatpush.msrb.mxu2 %v1824_v29  ;;  %854 = vmatpush.msrb.mxu3 %v1892_v43 }
 0x565   :  { %835 = vmatpush.msrb.mxu2 %v1833_v32  ;;  %855 = vmatpush.msrb.mxu3 %v1901_v46 }
 0x567   :  { %836 = vmatpush.msrb.mxu2 %v1841_v34  ;;  %856 = vmatpush.msrb.mxu3 %v1909_v48 }
 0x569   :  { %837 = vmatpush.msrb.mxu2 %v1851_v35  ;;  %857 = vmatpush.msrb.mxu3 %v1919_v49 }
 0x56b   :  { %838 = vmatpush.msrb.mxu2 %v1856_v36  ;;  %858 = vmatpush.msrb.mxu3 %v1926_v50 }
 0x56d   :  { %839 = vmatpush.msrb.mxu2 %v1863_v37  ;;  %859 = vmatpush.msrb.mxu3 %v1935_v53 }
 0x56f   :  { %840 = vmatpush.msrb.mxu2 %v1872_v40  ;;  %860 = vmatpush.msrb.mxu3 %v1943_v55 }
 0x5e3   :  { %v538_v29 = vpop.f32.mrf.mxu2  ;;  %v558_v50 = vpop.f32.mrf.mxu3 }
 0x5e4   :  { %v539_v32 = vadd.f32 %v538_v29, %v2031_v22  ;;  %v559_v2 = vadd.f32 %v558_v50, %v2035_v39 }
 0x5e6   :  { %v561_v34 = vadd.f32 %v539_v32, %v2003_v5 }
 0x5e8   :  { %v1536_v35 = vmul.f32 -1.442695, %v561_v34 }
 0x5ea   :  { %1602 = vpow2.f32 %v1536_v35 }
 0x5f0   :  { %v1603_v36 = vpop.eup %1602 }
 0x5f1   :  { %v565_v42 = vadd.f32 1.0, %v1603_v36 }
 0x5f3   :  { %1604 = vrcp.f32 %v565_v42  ;;  %v577_v48 = vand.u32 2147483648, %v565_v42  ;;  %v575_v40 = vand.u32 2147483647, %v565_v42  ;;  %vm571_vm1 = vweird.f32 %v565_v42 }
 0x5f5   :  { %v578_v55 = vor.u32 1.1754944e-38, %v577_v48  ;;  %vm576_vm4 = vcmp.eq.f32.partialorder %v575_v40, 8.507059e+37 }
 0x5f9   :  { %v1605_v43 = vpop.eup %1604 }
 0x5fa   :  { %v567_v37 = vmul.f32 %v1605_v43, %v565_v42  ;;  %vm572_vm0 = vweird.f32 %v1605_v43 }
 0x5fb   :  { %vm573_vm3 = vmor %vm571_vm1, %vm572_vm0 }
 0x5fc   :  { %v568_v46 = vsub.f32 1.0, %v567_v37 }
 0x5fe   :  { %v569_v49 = vmul.f32 %v1605_v43, %v568_v46 }
 0x600   :  { %v570_v53 = vadd.f32 %v1605_v43, %v569_v49 }
 0x602   :  { %v574_v5 = vsel %vm573_vm3, %v1605_v43, %v570_v53 }
 0x603   :  { %v579_v60 = vsel %vm576_vm4, %v578_v55, %v574_v5 }
 0x604   :  { %v581_v1 = vmul.f32 %v579_v60, %v559_v2  ;;  %v584_v9 = vsub.f32 1.0, %v579_v60  ;;  %v590_v11 = vmul.f32 %v579_v60, %v515_v58 }
 0x606   :  { %v582_v4 = vadd.f32 %v581_v1, %v2008_v8 }
 0x608   :  { %1606 = vtanh.f32 %v582_v4 }
 0x60e   :  { %v1607_v7 = vpop.eup %1606 }
 0x60f   :  { %586 = vrot.lane.b32.xlu0 %v1607_v7, %s1674_s27 }
 0x681   :  { %v587_v63 = vpop.permute.xlu0 %586 }
 0x682   :  { %v589_v13 = vmul.f32 %v587_v63, %v584_v9 }
 0x684   :  { %v591_v15 = vadd.f32 %v590_v11, %v589_v13 }
 0x686   :  { %593 = vrot.lane.b32.xlu1 %v591_v15, %s1674_s27 }
 0x6f8   :  { %v594_v16 = vpop.permute.xlu1 %593 }
 0x6f9   :  { %1537 = vmatmul.msk.f32.vlgmr.msra.gmra.mxu0 %vm289_vm7, %v594_v16  ;;  %1538 = vmatmul.msk.f32.vlgmr.msra.gmra.mxu1 %vm289_vm7, %v594_v16 }
 0x776   :  { %v614_v61 = vpop.f32.mrf.mxu0  ;;  %v634_v38 = vpop.f32.mrf.mxu1 }
 0x777   :  { %v615_v19 = vadd.f32 %v614_v61, %v2031_v22  ;;  %v635_v45 = vadd.f32 %v634_v38, %v2035_v39 }
 0x779   :  { %v637_v8 = vadd.f32 %v615_v19, %v2011_v10 }
 0x77b   :  { %v1539_v23 = vmul.f32 -1.442695, %v637_v8 }
 0x77d   :  { %1608 = vpow2.f32 %v1539_v23 }
 0x783   :  { %v1609_v24 = vpop.eup %1608 }
 0x784   :  { %v641_v25 = vadd.f32 1.0, %v1609_v24 }
 0x786   :  { %1610 = vrcp.f32 %v641_v25  ;;  %v653_v31 = vand.u32 2147483648, %v641_v25  ;;  %v651_v0 = vand.u32 2147483647, %v641_v25  ;;  %vm647_vm6 = vweird.f32 %v641_v25 }
 0x788   :  { %v654_v44 = vor.u32 1.1754944e-38, %v653_v31  ;;  %vm652_vm9 = vcmp.eq.f32.partialorder %v651_v0, 8.507059e+37 }
 0x78c   :  { %v1611_v26 = vpop.eup %1610 }
 0x78d   :  { %v643_v27 = vmul.f32 %v1611_v26, %v641_v25  ;;  %vm648_vm5 = vweird.f32 %v1611_v26 }
 0x78e   :  { %vm649_vm8 = vmor %vm647_vm6, %vm648_vm5 }
 0x78f   :  { %v644_v30 = vsub.f32 1.0, %v643_v27 }
 0x791   :  { %v645_v33 = vmul.f32 %v1611_v26, %v644_v30 }
 0x793   :  { %v646_v41 = vadd.f32 %v1611_v26, %v645_v33 }
 0x795   :  { %v650_v10 = vsel %vm649_vm8, %v1611_v26, %v646_v41  ;;  %vm915_vm8 = vcmask 1041408  }
 0x796   :  { %v655_v62 = vsel %vm652_vm9, %v654_v44, %v650_v10 }
 0x797   :  { %v657_v47 = vmul.f32 %v655_v62, %v635_v45  ;;  %v660_v54 = vsub.f32 1.0, %v655_v62  ;;  %v666_v57 = vmul.f32 %v655_v62, %v591_v15 }
 0x799   :  { %v658_v51 = vadd.f32 %v657_v47, %v2014_v12  ;;  %v235_v12 = vadd.f32 %v2088_v21, %v2000_v3 }
 0x79b   :  { %1612 = vtanh.f32 %v658_v51 }
 0x7a1   :  { %v1613_v52 = vpop.eup %1612 }
 0x7a2   :  { %662 = vrot.lane.b32.xlu2 %v1613_v52, %s1674_s27 }
 0x7fc   :  { %v663_v56 = vpop.permute.xlu2 %662 }
 0x7fd   :  { %v665_v58 = vmul.f32 %v663_v56, %v660_v54 }
 0x7ff   :  { %v667_v59 = vadd.f32 %v666_v57, %v665_v58 }
 0x801   :  { %669 = vrot.lane.b32.xlu0 %v667_v59, %s1674_s27 }
 0x873   :  { %v670_v29 = vpop.permute.xlu0 %669 }
 0x874   :  { %1540 = vmatmul.msk.f32.vlgmr.msra.gmra.mxu2 %vm289_vm7, %v670_v29  ;;  %1541 = vmatmul.msk.f32.vlgmr.msra.gmra.mxu3 %vm289_vm7, %v670_v29 }
 0x8f7   :  { %v690_v32 = vpop.f32.mrf.mxu2  ;;  %v710_v53 = vpop.f32.mrf.mxu3 }
 0x8f8   :  { %v691_v34 = vadd.f32 %v690_v32, %v2031_v22  ;;  %v711_v21 = vadd.f32 %v710_v53, %v2035_v39  ;;  %v2153_v32 = vld [vmem:[%s2403_s7] sm:$0xff]  ;;  %v282_v53 = vadd.f32 %v2113_v28, %v2005_v6  ;;  %v908_v6 = vld [vmem:[%s2400_s4 + $0x10] sm:$0xff]  ;;  %v907_v28 = vld [vmem:[%s2400_s4 + $0x8] sm:$0xff] }
 0x8fa   :  { %v713_v35 = vadd.f32 %v691_v34, %v235_v12 }
 0x8fc   :  { %v1542_v36 = vmul.f32 -1.442695, %v713_v35 }
 0x8fe   :  { %1614 = vpow2.f32 %v1542_v36 }
 0x904   :  { %v1615_v42 = vpop.eup %1614 }
 0x905   :  { %v717_v43 = vadd.f32 1.0, %v1615_v42 }
 0x907   :  { %1616 = vrcp.f32 %v717_v43  ;;  %v729_v49 = vand.u32 2147483648, %v717_v43  ;;  %v727_v50 = vand.u32 2147483647, %v717_v43  ;;  %vm723_vm11 = vweird.f32 %v717_v43 }
 0x909   :  { %v730_v3 = vor.u32 1.1754944e-38, %v729_v49  ;;  %vm728_vm13 = vcmp.eq.f32.partialorder %v727_v50, 8.507059e+37 }
 0x90d   :  { %v1617_v37 = vpop.eup %1616 }
 0x90e   :  { %v719_v46 = vmul.f32 %v1617_v37, %v717_v43  ;;  %vm724_vm10 = vweird.f32 %v1617_v37 }
 0x90f   :  { %vm725_vm12 = vmor %vm723_vm11, %vm724_vm10  ;;  %vm911_vm10 = vcmask 277504  }
 0x910   :  { %v720_v48 = vsub.f32 1.0, %v719_v46 }
 0x912   :  { %v721_v40 = vmul.f32 %v1617_v37, %v720_v48 }
 0x914   :  { %v722_v55 = vadd.f32 %v1617_v37, %v721_v40 }
 0x916   :  { %v726_v2 = vsel %vm725_vm12, %v1617_v37, %v722_v55 }
 0x917   :  { %v731_v5 = vsel %vm728_vm13, %v730_v3, %v726_v2  ;;  %v910_v2 = vld [vmem:[%s2400_s4 + $0x20] sm:$0x3]  ;;  %vm967_vm13 = vcmask 1040384  }
 0x918   :  { %v733_v60 = vmul.f32 %v731_v5, %v711_v21  ;;  %v736_v7 = vsub.f32 1.0, %v731_v5  ;;  %v742_v63 = vmul.f32 %v731_v5, %v667_v59  ;;  %1549 = vmatpush.msk.msra.mxu0 %vm915_vm8, %v910_v2  ;;  %v1082_v2 = vld [vmem:[#allocation2 + $0xf8] sm:$0xff] }
 0x91a   :  { %v734_v1 = vadd.f32 %v733_v60, %v2017_v14 }
 0x91c   :  { %1618 = vtanh.f32 %v734_v1 }
 0x922   :  { %v1619_v4 = vpop.eup %1618 }
 0x923   :  { %738 = vrot.lane.b32.xlu1 %v1619_v4, %s1674_s27 }
 0x995   :  { %v739_v9 = vpop.permute.xlu1 %738 }
 0x996   :  { %v741_v11 = vmul.f32 %v739_v9, %v736_v7  ;;  %v906_v9 = vld [vmem:[%s2400_s4] sm:$0xff] }
 0x998   :  { %v743_v13 = vadd.f32 %v742_v63, %v741_v11  ;;  %v940_v63 = vld [vmem:[%s2402_s6] sm:$0xff]  ;;  %v1675_v11 = vmov 1  }
 0x999   :  { %1581 = vset.pattern.permute.xlu0 %v1675_v11  ;;  %vm941_vm9 = vcmp.gt.f32.partialorder %v940_v63, 0.5  ;;  %v1069_v11 = vld [vmem:[#allocation2 + $0x90] sm:$0xff] }
 0x99a   :  { %745 = vrot.lane.b32.xlu2 %v743_v13, %s1674_s27 }
 0x9f4   :  { %v746_v15 = vpop.permute.xlu2 %745 }
 0x9f5   :  { %1543 = vmatmul.msk.f32.vlgmr.msrb.gmra.mxu0 %vm289_vm7, %v746_v15  ;;  %1544 = vmatmul.msk.f32.vlgmr.msrb.gmra.mxu1 %vm289_vm7, %v746_v15 }
 0xa72   :  { %v766_v16 = vpop.f32.mrf.mxu0  ;;  %v786_v33 = vpop.f32.mrf.mxu1 }
 0xa73   :  { %v767_v61 = vadd.f32 %v766_v16, %v2031_v22  ;;  %v787_v41 = vadd.f32 %v786_v33, %v2035_v39  ;;  %v997_v33 = vld [vmem:[%s2401_s5 + $0x8] sm:$0xff] }
 0xa75   :  { %v789_v14 = vadd.f32 %v767_v61, %v2020_v17 }
 0xa77   :  { %v1545_v19 = vmul.f32 -1.442695, %v789_v14 }
 0xa79   :  { %1620 = vpow2.f32 %v1545_v19  ;;  %v1003_v19 = vld [vmem:[%s2401_s5 + $0x38] sm:$0xff] }
 0xa7a   :  { %1015 = vmatpush.msra.mxu2 %v1003_v19  ;;  %v1173_v19 = vld [vmem:[%s2404_s8 + $0x38] sm:$0xff] }
 0xa7f   :  { %v1621_v8 = vpop.eup %1620 }
 0xa80   :  { %v793_v23 = vadd.f32 1.0, %v1621_v8  ;;  %v1002_v8 = vld [vmem:[%s2401_s5 + $0x30] sm:$0xff] }
 0xa81   :  { %1016 = vmatpush.msra.mxu2 %v1002_v8  ;;  %v1060_v8 = vld [vmem:[#allocation2 + $0x48] sm:$0xff] }
 0xa82   :  { %1622 = vrcp.f32 %v793_v23  ;;  %v805_v27 = vand.u32 2147483648, %v793_v23  ;;  %v803_v31 = vand.u32 2147483647, %v793_v23  ;;  %vm799_vm15 = vweird.f32 %v793_v23 }
 0xa84   :  { %v806_v38 = vor.u32 1.1754944e-38, %v805_v27  ;;  %vm804_vm1 = vcmp.eq.f32.partialorder %v803_v31, 8.507059e+37  ;;  %v56_v27 = vld [vmem:[%s2399_s3 + $0x3] ss:$0 sm:$0xff] }
 0xa88   :  { %v1623_v24 = vpop.eup %1622 }
 0xa89   :  { %v795_v25 = vmul.f32 %v1623_v24, %v793_v23  ;;  %vm800_vm14 = vweird.f32 %v1623_v24  ;;  %v1001_v23 = vld [vmem:[%s2401_s5 + $0x28] sm:$0xff] }
 0xa8a   :  { %vm801_vm0 = vmor %vm799_vm15, %vm800_vm14  ;;  %1017 = vmatpush.msra.mxu2 %v1001_v23  ;;  %vm969_vm14 = vcmask 15360   ;;  %v1061_v23 = vld [vmem:[#allocation2 + $0x50] sm:$0xff] }
 0xa8b   :  { %v796_v26 = vsub.f32 1.0, %v795_v25  ;;  %v999_v25 = vld [vmem:[%s2401_s5 + $0x18] sm:$0xff] }
 0xa8d   :  { %v797_v30 = vmul.f32 %v1623_v24, %v796_v26  ;;  %v998_v26 = vld [vmem:[%s2401_s5 + $0x10] sm:$0xff] }
 0xa8f   :  { %v798_v0 = vadd.f32 %v1623_v24, %v797_v30 }
 0xa91   :  { %v802_v17 = vsel %vm801_vm0, %v1623_v24, %v798_v0  ;;  %v1000_v24 = vld [vmem:[%s2401_s5 + $0x20] sm:$0xff] }
 0xa92   :  { %v807_v44 = vsel %vm804_vm1, %v806_v38, %v802_v17  ;;  %1018 = vmatpush.msra.mxu2 %v1000_v24  ;;  %v1062_v24 = vld [vmem:[#allocation2 + $0x58] sm:$0xff] }
 0xa93   :  { %v809_v45 = vmul.f32 %v807_v44, %v787_v41  ;;  %v812_v47 = vsub.f32 1.0, %v807_v44  ;;  %v818_v52 = vmul.f32 %v807_v44, %v743_v13  ;;  %v1676_v13 = vmov 0  }
 0xa94   :  { %1580 = vset.pattern.permute.xlu2 %v1676_v13  ;;  %v942_v15 = vsel %vm941_vm9, 1, %v1676_v13  ;;  %1019 = vmatpush.msra.mxu2 %v999_v25  ;;  %v1070_v13 = vld [vmem:[#allocation2 + $0x98] sm:$0xff]  ;;  %v1172_v25 = vld [vmem:[%s2404_s8 + $0x30] sm:$0xff] }
 0xa95   :  { %v810_v10 = vadd.f32 %v809_v45, %v2023_v18 }
 0xa96   :  { %1020 = vmatpush.msra.mxu2 %v998_v26  ;;  %v1056_v26 = vld [vmem:[#allocation2 + $0x28] sm:$0xff] }
 0xa97   :  { %1624 = vtanh.f32 %v810_v10 }
 0xa98   :  { %1021 = vmatpush.msra.mxu2 %v997_v33  ;;  %v1052_v33 = vld [vmem:[#allocation2 + $0x8] sm:$0xff] }
 0xa9d   :  { %v1625_v62 = vpop.eup %1624 }
 0xa9e   :  { %814 = vrot.lane.b32.xlu0 %v1625_v62, %s1674_s27 }
 0xb10   :  { %v815_v51 = vpop.permute.xlu0 %814 }
 0xb11   :  { %v817_v54 = vmul.f32 %v815_v51, %v812_v47 }
 0xb13   :  { %v819_v56 = vadd.f32 %v818_v52, %v817_v54 }
 0xb15   :  { %821 = vrot.lane.b32.xlu1 %v819_v56, %s1674_s27 }
 0xb1d   :  { %902 = vrot.lane.b32.xlu1 %v2153_v32, %s1672_s19 }
 0xb87   :  { %v822_v57 = vpop.permute.xlu1 %821 }
 0xb88   :  { %1546 = vmatmul.msk.f32.vlgmr.msrb.gmra.mxu2 %vm289_vm7, %v822_v57  ;;  %1547 = vmatmul.msk.f32.vlgmr.msrb.gmra.mxu3 %vm289_vm7, %v822_v57 }
 0xb8f   :  { %v903_v16 = vpop.permute.xlu1 %902 }
 0xc0b   :  { %v842_v58 = vpop.f32.mrf.mxu2  ;;  %v862_v37 = vpop.f32.mrf.mxu3 }
 0xc0c   :  { %v843_v59 = vadd.f32 %v842_v58, %v2031_v22  ;;  %v863_v49 = vadd.f32 %v862_v37, %v2035_v39  ;;  %v909_v39 = vld [vmem:[%s2400_s4 + $0x18] sm:$0xff] }
 0xc0d   :  { %931 = vmatpush.msra.mxu0 %v909_v39  ;;  %v1063_v39 = vld [vmem:[#allocation2 + $0x60] sm:$0xff] }
 0xc0e   :  { %v865_v18 = vadd.f32 %v843_v59, %v2026_v20 }
 0xc0f   :  { %932 = vmatpush.msra.mxu0 %v908_v6  ;;  %v1076_v6 = vld [vmem:[#allocation2 + $0xc8] sm:$0xff] }
 0xc10   :  { %v1548_v29 = vmul.f32 -1.442695, %v865_v18 }
 0xc11   :  { %933 = vmatpush.msra.mxu0 %v907_v28  ;;  %v1077_v28 = vld [vmem:[#allocation2 + $0xd0] sm:$0xff] }
 0xc12   :  { %1626 = vpow2.f32 %v1548_v29 }
 0xc13   :  { %934 = vmatpush.msra.mxu0 %v906_v9  ;;  %v1055_v9 = vld [vmem:[#allocation2 + $0x20] sm:$0xff] }
 0xc18   :  { %v1627_v12 = vpop.eup %1626 }
 0xc19   :  { %v869_v34 = vadd.f32 1.0, %v1627_v12 }
 0xc1b   :  { %1628 = vrcp.f32 %v869_v34  ;;  %v881_v43 = vand.u32 2147483648, %v869_v34  ;;  %v879_v20 = vand.u32 2147483647, %v869_v34  ;;  %vm875_vm4 = vweird.f32 %v869_v34 }
 0xc1d   :  { %v882_v48 = vor.u32 1.1754944e-38, %v881_v43  ;;  %vm880_vm6 = vcmp.eq.f32.partialorder %v879_v20, 8.507059e+37 }
 0xc21   :  { %v1629_v35 = vpop.eup %1628 }
 0xc22   :  { %v871_v36 = vmul.f32 %v1629_v35, %v869_v34  ;;  %vm876_vm3 = vweird.f32 %v1629_v35 }
 0xc23   :  { %vm877_vm5 = vmor %vm875_vm4, %vm876_vm3 }
 0xc24   :  { %v872_v42 = vsub.f32 1.0, %v871_v36 }
 0xc26   :  { %v873_v22 = vmul.f32 %v1629_v35, %v872_v42  ;;  %v57_v42 = vld [vmem:[%s2399_s3 + $0x4] ss:$0 sm:$0xff] }
 0xc28   :  { %v874_v46 = vadd.f32 %v1629_v35, %v873_v22 }
 0xc2a   :  { %v878_v40 = vsel %vm877_vm5, %v1629_v35, %v874_v46  ;;  %v996_v35 = vld [vmem:[%s2401_s5] sm:$0xff] }
 0xc2b   :  { %v883_v50 = vsel %vm880_vm6, %v882_v48, %v878_v40  ;;  %1022 = vmatpush.msra.mxu2 %v996_v35  ;;  %v1079_v40 = vld [vmem:[#allocation2 + $0xe0] sm:$0xff]  ;;  %v1181_v35 = vld [vmem:[%s2404_s8 + $0x78] sm:$0xff] }
 0xc2c   :  { %v885_v55 = vmul.f32 %v883_v50, %v863_v49  ;;  %v888_v5 = vsub.f32 1.0, %v883_v50  ;;  %v894_v1 = vmul.f32 %v883_v50, %v819_v56  ;;  %1094 = vmatpush.msrb.mxu0 %v1079_v40  ;;  %v1075_v50 = vld [vmem:[#allocation2 + $0xc0] sm:$0xff]  ;;  %v1177_v40 = vld [vmem:[%s2404_s8 + $0x58] sm:$0xff] }
 0xc2d   :  { %1154 = vmatpush.msrb.mxu2 %v1082_v2 }
 0xc2e   :  { %v886_v3 = vadd.f32 %v885_v55, %v282_v53  ;;  %1095 = vmatpush.msrb.mxu0 %v1075_v50  ;;  %v1071_v53 = vld [vmem:[#allocation2 + $0xa0] sm:$0xff]  ;;  %v1175_v50 = vld [vmem:[%s2404_s8 + $0x48] sm:$0xff] }
 0xc2f   :  { %v1067_v55 = vld [vmem:[#allocation2 + $0x80] sm:$0xff] }
 0xc30   :  { %1630 = vtanh.f32 %v886_v3  ;;  %1096 = vmatpush.msrb.mxu0 %v1071_v53  ;;  %v1080_v3 = vld [vmem:[#allocation2 + $0xe8] sm:$0xff]  ;;  %v1174_v53 = vld [vmem:[%s2404_s8 + $0x40] sm:$0xff] }
 0xc32   :  { %1097 = vmatpush.msrb.mxu0 %v1067_v55 }
 0xc34   :  { %1098 = vmatpush.msrb.mxu0 %v1063_v39 }
 0xc36   :  { %v1631_v21 = vpop.eup %1630 }
 0xc37   :  { %890 = vrot.lane.b32.xlu2 %v1631_v21, %s1674_s27  ;;  %v1081_v21 = vld [vmem:[#allocation2 + $0xf0] sm:$0xff] }
 0xc38   :  { %1134 = vmatpush.msra.mxu3 %v1081_v21  ;;  %v58_v21 = vld [vmem:[%s2399_s3 + $0x5] ss:$0 sm:$0xff] }
 0xc3a   :  { %1135 = vmatpush.msra.mxu3 %v1077_v28 }
 0xc3f   :  { %944 = vperm.xlu2 %1580, %v942_v15  }
 0xc91   :  { %v891_v60 = vpop.permute.xlu2 %890 }
 0xc92   :  { %v893_v4 = vmul.f32 %v891_v60, %v888_v5  ;;  %v1078_v5 = vld [vmem:[#allocation2 + $0xd8] sm:$0xff]  ;;  %v1059_v60 = vld [vmem:[#allocation2 + $0x40] sm:$0xff] }
 0xc93   :  { %1155 = vmatpush.msrb.mxu2 %v1078_v5  ;;  %1099 = vmatpush.msrb.mxu0 %v1059_v60  ;;  %v1309_v60 = vld [vmem:[#allocation2 + $0x2e0] sm:$0xff] }
 0xc94   :  { %v895_v7 = vadd.f32 %v894_v1, %v893_v4  ;;  %v1072_v1 = vld [vmem:[#allocation2 + $0xa8] sm:$0xff]  ;;  %v1073_v4 = vld [vmem:[#allocation2 + $0xb0] sm:$0xff] }
 0xc95   :  { %1136 = vmatpush.msra.mxu3 %v1073_v4  ;;  %1100 = vmatpush.msrb.mxu0 %v1055_v9  ;;  %v1311_v4 = vld [vmem:[#allocation2 + $0x2f0] sm:$0xff]  ;;  %v1312_v9 = vld [vmem:[#allocation2 + $0x2f8] sm:$0xff] }
 0xc96   :  { %1027 = vrot.lane.b32.xlu1 %v895_v7, %s1674_s27  ;;  %898 = vrot.lane.b32.xlu0 %v895_v7, %s1672_s19  ;;  %v1074_v7 = vld [vmem:[#allocation2 + $0xb8] sm:$0xff] }
 0xc97   :  { %1156 = vmatpush.msrb.mxu2 %v1074_v7  ;;  %1137 = vmatpush.msra.mxu3 %v1069_v11  ;;  %v1677_v7 = vmov 2   ;;  %v1306_v11 = vld [vmem:[#allocation2 + $0x2c8] sm:$0xff] }
 0xc99   :  { %v945_v31 = vpop.permute.xlu2 %944  ;;  %1157 = vmatpush.msrb.mxu2 %v1070_v13  ;;  %v1307_v13 = vld [vmem:[#allocation2 + $0x2d0] sm:$0xff] }
 0xc9a   :  { %vm946_vm12 = vcmp.eq.s32.totalorder %v945_v31, 1  ;;  %v1171_v31 = vld [vmem:[%s2404_s8 + $0x28] sm:$0xff] }
 0xc9e   :  { %956 = vperm.xlu0 %1581, %v942_v15   ;;  %v1051_v15 = vld [vmem:[#allocation2] sm:$0xff] }
 0xc9f   :  { %1101 = vmatpush.msrb.mxu0 %v1051_v15  ;;  %v1308_v15 = vld [vmem:[#allocation2 + $0x2d8] sm:$0xff] }
 0xca6   :  { %1582 = vset.pattern.permute.xlu0 %v1677_v7  ;;  %v1250_v7 = vld [vmem:[#allocation2 + $0x108] sm:$0xff] }
 0xca7   :  { %1398 = vperm.xlu0 %1582, %v2153_v32  }
 0xd08   :  { %v899_v61 = vpop.permute.xlu0 %898  ;;  %v1028_v20 = vpop.permute.xlu1 %1027 }
 0xd09   :  { %v905_v14 = vsel %vm177_vm2, %v899_v61, %v903_v16  ;;  %v1064_v16 = vld [vmem:[#allocation2 + $0x68] sm:$0xff]  ;;  %v1065_v61 = vld [vmem:[#allocation2 + $0x70] sm:$0xff] }
 0xd0a   :  { %1550 = vmatmul.msk.f32.vlgmr.msra.gmra.mxu0 %vm911_vm10, %v905_v14  ;;  %v1066_v14 = vld [vmem:[#allocation2 + $0x78] sm:$0xff]  ;;  %1138 = vmatpush.msra.mxu3 %v1065_v61  ;;  %v1302_v61 = vld [vmem:[#allocation2 + $0x2a8] sm:$0xff] }
 0xd0b   :  { %1158 = vmatpush.msrb.mxu2 %v1066_v14  ;;  %1201 = vmatpush.msra.mxu0 %v1173_v19  ;;  %v1303_v14 = vld [vmem:[#allocation2 + $0x2b0] sm:$0xff]  ;;  %v1304_v19 = vld [vmem:[#allocation2 + $0x2b8] sm:$0xff] }
 0xd0c   :  { %1139 = vmatpush.msra.mxu3 %v1061_v23  ;;  %v1298_v23 = vld [vmem:[#allocation2 + $0x288] sm:$0xff] }
 0xd0d   :  { %1159 = vmatpush.msrb.mxu2 %v1062_v24  ;;  %1202 = vmatpush.msra.mxu0 %v1172_v25  ;;  %v1299_v24 = vld [vmem:[#allocation2 + $0x290] sm:$0xff]  ;;  %v1300_v25 = vld [vmem:[#allocation2 + $0x298] sm:$0xff] }
 0xd0f   :  { %1203 = vmatpush.msra.mxu0 %v1171_v31  ;;  %v1296_v31 = vld [vmem:[#allocation2 + $0x278] sm:$0xff] }
 0xd10   :  { %v957_v30 = vpop.permute.xlu0 %956 }
 0xd11   :  { %vm958_vm11 = vcmp.eq.s32.totalorder %v957_v30, 1  ;;  %v1058_v30 = vld [vmem:[#allocation2 + $0x38] sm:$0xff] }
 0xd12   :  { %1160 = vmatpush.msrb.mxu2 %v1058_v30  ;;  %v1295_v30 = vld [vmem:[#allocation2 + $0x270] sm:$0xff] }
 0xd87   :  { %v936_v0 = vpop.f32.mrf.mxu0 }
 0xd88   :  { %v937_v38 = vadd.f32 %v936_v0, %v56_v27  ;;  %v1057_v27 = vld [vmem:[#allocation2 + $0x30] sm:$0xff] }
 0xd89   :  { %1140 = vmatpush.msra.mxu3 %v1057_v27  ;;  %v1053_v0 = vld [vmem:[#allocation2 + $0x10] sm:$0xff]  ;;  %v1294_v27 = vld [vmem:[#allocation2 + $0x268] sm:$0xff] }
 0xd8a   :  { %v939_v41 = vmax.f32 %v937_v38, 0.0  ;;  %v1054_v38 = vld [vmem:[#allocation2 + $0x18] sm:$0xff] }
 0xd8b   :  { %1141 = vmatpush.msra.mxu3 %v1053_v0  ;;  %1161 = vmatpush.msrb.mxu2 %v1054_v38  ;;  %v59_v0 = vld [vmem:[%s2399_s3 + $0x6] ss:$0 sm:$0xff] }
 0xd8c   :  { %v959_v17 = vsel %vm958_vm11, %v939_v41, -1e+30  ;;  %v947_v44 = vsel %vm946_vm12, %v939_v41, -1e+30  ;;  %v1170_v41 = vld [vmem:[%s2404_s8 + $0x20] sm:$0xff] }
 0xd8d   :  { %v960_v45 = vsel %vm289_vm7, %v959_v17, -inf  ;;  %v948_v10 = vsel %vm289_vm7, %v947_v44, -inf  ;;  %1204 = vmatpush.msra.mxu0 %v1170_v41  ;;  %v1169_v17 = vld [vmem:[%s2404_s8 + $0x18] sm:$0xff]  ;;  %v1168_v44 = vld [vmem:[%s2404_s8 + $0x10] sm:$0xff]  ;;  %1313 = vmatpush.msrb.mxu3 %v1309_v60 }
 0xd8e   :  { %v961_v62 = vrot.slane %v960_v45, 4  ;;  %v949_v47 = vrot.slane %v948_v10, 4  ;;  %v1255_v60 = vld [vmem:[#allocation2 + $0x130] sm:$0xff] }
 0xd8f   :  { %1205 = vmatpush.msra.mxu0 %v1169_v17 }
 0xd90   :  { %v962_v51 = vmax.f32 %v960_v45, %v961_v62  ;;  %v950_v52 = vmax.f32 %v948_v10, %v949_v47  ;;  %v1167_v45 = vld [vmem:[%s2404_s8 + $0x8] sm:$0xff]  ;;  %v1166_v10 = vld [vmem:[%s2404_s8] sm:$0xff]  ;;  %v1189_v62 = vld [vmem:[%s2404_s8 + $0xb8] sm:$0xff] }
 0xd91   :  { %1206 = vmatpush.msra.mxu0 %v1168_v44  ;;  %v1188_v47 = vld [vmem:[%s2404_s8 + $0xb0] sm:$0xff]  ;;  %v1289_v44 = vld [vmem:[#allocation2 + $0x240] sm:$0xff] }
 0xd92   :  { %v963_v54 = vrot.slane %v962_v51, 2  ;;  %v951_v56 = vrot.slane %v950_v52, 2 }
 0xd93   :  { %1207 = vmatpush.msra.mxu0 %v1167_v45  ;;  %v1290_v45 = vld [vmem:[#allocation2 + $0x248] sm:$0xff] }
 0xd94   :  { %v964_v57 = vmax.f32 %v962_v51, %v963_v54  ;;  %v952_v58 = vmax.f32 %v950_v52, %v951_v56  ;;  %v1187_v54 = vld [vmem:[%s2404_s8 + $0xa8] sm:$0xff]  ;;  %v1186_v56 = vld [vmem:[%s2404_s8 + $0xa0] sm:$0xff] }
 0xd95   :  { %1208 = vmatpush.msra.mxu0 %v1166_v10  ;;  %v1291_v10 = vld [vmem:[#allocation2 + $0x250] sm:$0xff] }
 0xd96   :  { %v965_v59 = vrot.slane %v964_v57, 1  ;;  %v953_v18 = vrot.slane %v952_v58, 1 }
 0xd98   :  { %v966_v29 = vmax.f32 %v964_v57, %v965_v59  ;;  %v954_v12 = vmax.f32 %v952_v58, %v953_v18  ;;  %v1185_v57 = vld [vmem:[%s2404_s8 + $0x98] sm:$0xff]  ;;  %v1184_v58 = vld [vmem:[%s2404_s8 + $0x90] sm:$0xff]  ;;  %v1183_v18 = vld [vmem:[%s2404_s8 + $0x88] sm:$0xff] }
 0xd9a   :  { %v968_v34 = vsel %vm967_vm13, %v954_v12, %v966_v29  ;;  %v1182_v12 = vld [vmem:[%s2404_s8 + $0x80] sm:$0xff] }
 0xd9b   :  { %1551 = vmatpush.msk.msra.mxu1 %vm915_vm8, %v968_v34 }
 0xd9c   :  { %1552 = vmatmul.msk.f32.vlgmr.msra.gmra.mxu1 %vm969_vm14, %v940_v63  ;;  %v1068_v63 = vld [vmem:[#allocation2 + $0x88] sm:$0xff] }
 0xd9d   :  { %1114 = vmatpush.msrb.mxu1 %v1080_v3 }
 0xd9f   :  { %1115 = vmatpush.msrb.mxu1 %v1076_v6 }
 0xda1   :  { %1116 = vmatpush.msrb.mxu1 %v1072_v1  ;;  %v1310_v1 = vld [vmem:[#allocation2 + $0x2e8] sm:$0xff] }
 0xda3   :  { %1117 = vmatpush.msrb.mxu1 %v1068_v63  ;;  %v1305_v63 = vld [vmem:[#allocation2 + $0x2c0] sm:$0xff] }
 0xda4   :  { %1314 = vmatpush.msrb.mxu3 %v1305_v63  ;;  %v1252_v63 = vld [vmem:[#allocation2 + $0x118] sm:$0xff] }
 0xda5   :  { %1118 = vmatpush.msrb.mxu1 %v1064_v16  ;;  %v1301_v16 = vld [vmem:[#allocation2 + $0x2a0] sm:$0xff] }
 0xda6   :  { %1315 = vmatpush.msrb.mxu3 %v1301_v16  ;;  %v1399_v16 = vpop.permute.xlu0 %1398 }
 0xda7   :  { %1119 = vmatpush.msrb.mxu1 %v1060_v8  ;;  %v1297_v8 = vld [vmem:[#allocation2 + $0x280] sm:$0xff] }
 0xda8   :  { %1316 = vmatpush.msrb.mxu3 %v1297_v8 }
 0xda9   :  { %1120 = vmatpush.msrb.mxu1 %v1056_v26  ;;  %v1293_v26 = vld [vmem:[#allocation2 + $0x260] sm:$0xff] }
 0xdaa   :  { %1317 = vmatpush.msrb.mxu3 %v1293_v26 }
 0xdab   :  { %1121 = vmatpush.msrb.mxu1 %v1052_v33  ;;  %v1678_v33 = vmov 3  }
 0xdac   :  { %1583 = vset.pattern.permute.xlu0 %v1678_v33  ;;  %1318 = vmatpush.msrb.mxu3 %v1289_v44 }
 0xdad   :  { %1214 = vmatpush.msra.mxu1 %v1189_v62  ;;  %1410 = vperm.xlu0 %1583, %v2153_v32   ;;  %v1292_v32 = vld [vmem:[#allocation2 + $0x258] sm:$0xff]  ;;  %v1285_v62 = vld [vmem:[#allocation2 + $0x220] sm:$0xff] }
 0xdae   :  { %1319 = vmatpush.msrb.mxu3 %v1285_v62 }
 0xdaf   :  { %1215 = vmatpush.msra.mxu1 %v1188_v47  ;;  %v1286_v47 = vld [vmem:[#allocation2 + $0x228] sm:$0xff] }
 0xdb1   :  { %1216 = vmatpush.msra.mxu1 %v1187_v54  ;;  %v1281_v54 = vld [vmem:[#allocation2 + $0x200] sm:$0xff] }
 0xdb2   :  { %1320 = vmatpush.msrb.mxu3 %v1281_v54 }
 0xdb3   :  { %1217 = vmatpush.msra.mxu1 %v1186_v56  ;;  %v1282_v56 = vld [vmem:[#allocation2 + $0x208] sm:$0xff] }
 0xdb5   :  { %1218 = vmatpush.msra.mxu1 %v1185_v57  ;;  %v1283_v57 = vld [vmem:[#allocation2 + $0x210] sm:$0xff] }
 0xdb7   :  { %1219 = vmatpush.msra.mxu1 %v1184_v58  ;;  %v1284_v58 = vld [vmem:[#allocation2 + $0x218] sm:$0xff] }
 0xdb9   :  { %1220 = vmatpush.msra.mxu1 %v1183_v18  ;;  %v1278_v18 = vld [vmem:[#allocation2 + $0x1e8] sm:$0xff] }
 0xdbb   :  { %1221 = vmatpush.msra.mxu1 %v1182_v12  ;;  %v1280_v12 = vld [vmem:[#allocation2 + $0x1f8] sm:$0xff] }
 0xdbd   :  { %1222 = vmatpush.msra.mxu1 %v1181_v35  ;;  %v1274_v35 = vld [vmem:[#allocation2 + $0x1c8] sm:$0xff] }
 0xe19   :  { %v993_v36 = vpop.f32.mrf.mxu1 }
 0xe1a   :  { %1553 = vmatmul.msk.f32.vlgmr.msra.gmra.mxu2 %vm289_vm7, %v993_v36 }
 0xe1b   :  { %1333 = vmatpush.msra.mxu2 %v1310_v1  ;;  %v1256_v1 = vld [vmem:[#allocation2 + $0x138] sm:$0xff] }
 0xe1d   :  { %1334 = vmatpush.msra.mxu2 %v1306_v11  ;;  %v1393_v11 = vld [vmem:[#allocation2 + $0x300] sm:$0x3] }
 0xe1e   :  { %v1413_v26 = vperm.slane %v1393_v11, 1 }
 0xe1f   :  { %1335 = vmatpush.msra.mxu2 %v1302_v61  ;;  %v1396_v61 = vld [vmem:[#allocation2 + $0x318] sm:$0x3] }
 0xe21   :  { %1336 = vmatpush.msra.mxu2 %v1298_v23  ;;  %v1404_v23 = vperm.slane %v1396_v61, 0 }
 0xe23   :  { %1337 = vmatpush.msra.mxu2 %v1294_v27  ;;  %v1408_v33 = vsub.f32 %v1399_v16, %v1404_v23 }
 0xe25   :  { %1338 = vmatpush.msra.mxu2 %v1290_v45  ;;  %v1411_v45 = vpop.permute.xlu0 %1410 }
 0xe27   :  { %1339 = vmatpush.msra.mxu2 %v1286_v47 }
 0xe29   :  { %1340 = vmatpush.msra.mxu2 %v1282_v56 }
 0xe2b   :  { %1341 = vmatpush.msra.mxu2 %v1278_v18 }
 0xe2d   :  { %1342 = vmatpush.msra.mxu2 %v1274_v35 }
 0xe9d   :  { %v1024_v43 = vpop.f32.mrf.mxu2 }
 0xe9e   :  { %v1025_v22 = vadd.f32 %v1024_v43, %v57_v42 }
 0xea0   :  { %1031 = vrot.lane.b32.xlu2 %v1025_v22, %s1672_s19 }
 0xefa   :  { %v1032_v37 = vpop.permute.xlu2 %1031 }
 0xefb   :  { %v2219_v46 = vsel %vm177_vm2, %v1028_v20, %v1032_v37  ;;  %v1180_v37 = vld [vmem:[%s2404_s8 + $0x70] sm:$0xff] }
 0xefc   :  { %v1035_v48 = vmul.f32 %v2219_v46, %v2219_v46  ;;  %1223 = vmatpush.msra.mxu1 %v1180_v37  ;;  %v1272_v37 = vld [vmem:[#allocation2 + $0x1b8] sm:$0xff] }
 0xefe   :  { %v1036_v49 = vsel %vm289_vm7, %v1035_v48, 0.0  ;;  %v1179_v48 = vld [vmem:[%s2404_s8 + $0x68] sm:$0xff] }
 0xeff   :  { %1037 = vadd.xlane.f32.xlu1 %v1036_v49  ;;  %v1178_v49 = vld [vmem:[%s2404_s8 + $0x60] sm:$0xff]  ;;  %1224 = vmatpush.msra.mxu1 %v1179_v48 }
 0xf00   :  { %v1265_v48 = vld [vmem:[#allocation2 + $0x180] sm:$0xff] }
 0xf01   :  { %1225 = vmatpush.msra.mxu1 %v1178_v49  ;;  %v1266_v49 = vld [vmem:[#allocation2 + $0x188] sm:$0xff] }
 0xf03   :  { %1226 = vmatpush.msra.mxu1 %v1177_v40  ;;  %v1267_v40 = vld [vmem:[#allocation2 + $0x190] sm:$0xff] }
 0xf72   :  { %v1038_v51 = vpop.xlane.xlu1 %1037 }
 0xf73   :  { %v1039_v52 = vmax.f32 %v1038_v51, 1e-24  ;;  %v1287_v51 = vld [vmem:[#allocation2 + $0x230] sm:$0xff] }
 0xf75   :  { %1632 = vrsqrt.f32 %v1039_v52  ;;  %vm1046_vm15 = vweird.f32 %v1039_v52 }
 0xf7b   :  { %v1633_v59 = vpop.eup %1632 }
 0xf7c   :  { %v1041_v29 = vmul.f32 %v1633_v59, %v1039_v52  ;;  %vm1047_vm2 = vweird.f32 %v1633_v59  ;;  %v1288_v52 = vld [vmem:[#allocation2 + $0x238] sm:$0xff] }
 0xf7d   :  { %vm1048_vm0 = vmor %vm1046_vm15, %vm1047_vm2 }
 0xf7e   :  { %v1042_v34 = vmul.f32 %v1633_v59, %v1041_v29  ;;  %v1279_v29 = vld [vmem:[#allocation2 + $0x1f0] sm:$0xff] }
 0xf80   :  { %v1043_v36 = vmul.f32 0.5, %v1042_v34  ;;  %v1273_v34 = vld [vmem:[#allocation2 + $0x1c0] sm:$0xff] }
 0xf82   :  { %v1044_v42 = vsub.f32 1.5, %v1043_v36  ;;  %v1275_v36 = vld [vmem:[#allocation2 + $0x1d0] sm:$0xff] }
 0xf84   :  { %v1045_v43 = vmul.f32 %v1633_v59, %v1044_v42  ;;  %v1276_v42 = vld [vmem:[#allocation2 + $0x1d8] sm:$0xff] }
 0xf86   :  { %v1049_v22 = vsel %vm1048_vm0, %v1633_v59, %v1045_v43  ;;  %v1277_v59 = vld [vmem:[#allocation2 + $0x1e0] sm:$0xff] }
 0xf87   :  { %v1050_v20 = vmul.f32 %v1049_v22, %v2219_v46  ;;  %1321 = vmatpush.msrb.mxu3 %v1277_v59  ;;  %v1269_v43 = vld [vmem:[#allocation2 + $0x1a0] sm:$0xff]  ;;  %v1270_v22 = vld [vmem:[#allocation2 + $0x1a8] sm:$0xff] }
 0xf88   :  { %1343 = vmatpush.msra.mxu2 %v1270_v22 }
 0xf89   :  { %1554 = vmatmul.msk.f32.vlgmr.msrb.gmra.mxu0 %vm289_vm7, %v1050_v20  ;;  %1555 = vmatmul.msk.f32.vlgmr.msrb.gmra.mxu1 %vm289_vm7, %v1050_v20 }
 0xf8a   :  { %1556 = vmatmul.msk.f32.vlgmr.msra.gmra.mxu3 %vm289_vm7, %v1050_v20  ;;  %1557 = vmatmul.msk.f32.vlgmr.msrb.gmra.mxu2 %vm289_vm7, %v1050_v20  ;;  %v1271_v20 = vld [vmem:[#allocation2 + $0x1b0] sm:$0xff] }
 0xf8b   :  { %1353 = vmatpush.msrb.mxu0 %v1311_v4  ;;  %1322 = vmatpush.msrb.mxu3 %v1273_v34  ;;  %v1249_v4 = vld [vmem:[#allocation2 + $0x100] sm:$0xff] }
 0xf8c   :  { %1344 = vmatpush.msra.mxu2 %v1266_v49 }
 0xf8d   :  { %1354 = vmatpush.msrb.mxu0 %v1307_v13  ;;  %1323 = vmatpush.msrb.mxu3 %v1269_v43  ;;  %v1394_v13 = vld [vmem:[#allocation2 + $0x308] sm:$0x3] }
 0xf8e   :  { %v1414_v27 = vperm.slane %v1394_v13, 1 }
 0xf8f   :  { %1355 = vmatpush.msrb.mxu0 %v1303_v14  ;;  %1324 = vmatpush.msrb.mxu3 %v1265_v48  ;;  %v1401_v14 = vperm.slane %v1393_v11, 0 }
 0xf90   :  { %v1418_v62 = vsub.f32 %v1411_v45, %v1414_v27 }
 0xf91   :  { %1558 = vmatmul.msk.f32.vlgmr.msra.gmra.mxu0 %vm289_vm7, %v2219_v46  ;;  %v1176_v46 = vld [vmem:[%s2404_s8 + $0x50] sm:$0xff] }
 0xf92   :  { %1227 = vmatpush.msra.mxu1 %v1176_v46  ;;  %1356 = vmatpush.msrb.mxu0 %v1299_v24  ;;  %v1268_v46 = vld [vmem:[#allocation2 + $0x198] sm:$0xff]  ;;  %v1405_v24 = vsub.f32 %v1399_v16, %v1401_v14 }
 0xf94   :  { %1228 = vmatpush.msra.mxu1 %v1175_v50  ;;  %1357 = vmatpush.msrb.mxu0 %v1295_v30  ;;  %v1261_v50 = vld [vmem:[#allocation2 + $0x160] sm:$0xff] }
 0xf95   :  { %1325 = vmatpush.msrb.mxu3 %v1261_v50 }
 0xf96   :  { %1229 = vmatpush.msra.mxu1 %v1174_v53  ;;  %1358 = vmatpush.msrb.mxu0 %v1291_v10  ;;  %v1262_v53 = vld [vmem:[#allocation2 + $0x168] sm:$0xff] }
 0xf97   :  { %1345 = vmatpush.msra.mxu2 %v1262_v53 }
 0xf98   :  { %1373 = vmatpush.msrb.mxu1 %v1312_v9  ;;  %1359 = vmatpush.msrb.mxu0 %v1287_v51  ;;  %v1251_v9 = vld [vmem:[#allocation2 + $0x110] sm:$0xff] }
 0xf9a   :  { %1374 = vmatpush.msrb.mxu1 %v1308_v15  ;;  %1360 = vmatpush.msrb.mxu0 %v1283_v57  ;;  %v1395_v15 = vld [vmem:[#allocation2 + $0x310] sm:$0x3]  ;;  %v1426_v57 = vmul.f32 %v1418_v62, %v1418_v62 }
 0xf9b   :  { %v1403_v8 = vperm.slane %v1395_v15, 0  ;;  %v1415_v30 = vperm.slane %v1395_v15, 1 }
 0xf9c   :  { %1375 = vmatpush.msrb.mxu1 %v1304_v19  ;;  %1361 = vmatpush.msrb.mxu0 %v1279_v29  ;;  %v1402_v19 = vperm.slane %v1394_v13, 0 }
 0xf9d   :  { %v1419_v47 = vsub.f32 %v1411_v45, %v1415_v30 }
 0xf9e   :  { %1376 = vmatpush.msrb.mxu1 %v1300_v25  ;;  %1362 = vmatpush.msrb.mxu0 %v1275_v36  ;;  %v1406_v25 = vsub.f32 %v1399_v16, %v1402_v19 }
 0xfa0   :  { %1377 = vmatpush.msrb.mxu1 %v1296_v31  ;;  %1363 = vmatpush.msrb.mxu0 %v1271_v20  ;;  %v1407_v31 = vsub.f32 %v1399_v16, %v1403_v8  ;;  %v1422_v44 = vmul.f32 %v1406_v25, %v1406_v25 }
 0xfa2   :  { %1378 = vmatpush.msrb.mxu1 %v1292_v32  ;;  %1364 = vmatpush.msrb.mxu0 %v1267_v40  ;;  %v1417_v32 = vsub.f32 %v1411_v45, %v1413_v26  ;;  %v1423_v51 = vmul.f32 %v1407_v31, %v1407_v31  ;;  %v2329_v29 = vadd.f32 %v1426_v57, %v1422_v44 }
 0xfa4   :  { %1379 = vmatpush.msrb.mxu1 %v1288_v52  ;;  %v1424_v52 = vmul.f32 %v1408_v33, %v1408_v33  ;;  %v1425_v56 = vmul.f32 %v1417_v32, %v1417_v32  ;;  %vm1452_vm6 = vcmp.eq.f32.partialorder %v2329_v29, inf  ;;  %vm1454_vm8 = vcmp.eq.f32.partialorder %v2329_v29, 0.0 }
 0xfa6   :  { %1380 = vmatpush.msrb.mxu1 %v1284_v58  ;;  %v1427_v58 = vmul.f32 %v1419_v47, %v1419_v47 }
 0xfa8   :  { %1381 = vmatpush.msrb.mxu1 %v1280_v12  ;;  %v2331_v12 = vadd.f32 %v1427_v58, %v1423_v51 }
 0xfaa   :  { %1382 = vmatpush.msrb.mxu1 %v1276_v42  ;;  %vm1464_vm9 = vcmp.eq.f32.partialorder %v2331_v12, inf  ;;  %vm1466_vm10 = vcmp.eq.f32.partialorder %v2331_v12, 0.0  ;;  %v1467_v8 = vand.u32 2147483648, %v2331_v12 }
 0xfac   :  { %1383 = vmatpush.msrb.mxu1 %v1272_v37 }
 0xfae   :  { %1384 = vmatpush.msrb.mxu1 %v1268_v46 }
0x1006   :  { %v1103_v55 = vpop.f32.mrf.mxu0  ;;  %v1123_v3 = vpop.f32.mrf.mxu1 }
0x1007   :  { %1481 = vst [vmem:[%s2406_s10] sm:$0xff] %v1103_v55  ;;  %v1263_v55 = vld [vmem:[#allocation2 + $0x170] sm:$0xff] }
0x1008   :  { %1482 = vst [vmem:[%s2406_s10 + $0x8] sm:$0xff] %v1123_v3  ;;  %v1264_v3 = vld [vmem:[#allocation2 + $0x178] sm:$0xff]  ;;  %1365 = vmatpush.msrb.mxu0 %v1263_v55 }
0x1009   :  { %1385 = vmatpush.msrb.mxu1 %v1264_v3 }
0x100d   :  { %v1143_v2 = vpop.f32.mrf.mxu3  ;;  %v1163_v39 = vpop.f32.mrf.mxu2 }
0x100e   :  { %1483 = vst [vmem:[%s2406_s10 + $0x10] sm:$0xff] %v1143_v2  ;;  %v1210_v6 = vpop.f32.mrf.mxu0  ;;  %v1258_v2 = vld [vmem:[#allocation2 + $0x148] sm:$0xff] }
0x100f   :  { %1484 = vst [vmem:[%s2406_s10 + $0x18] sm:$0xff] %v1163_v39  ;;  %v1211_v28 = vadd.f32 %v1210_v6, %v58_v21  ;;  %v1257_v21 = vld [vmem:[#allocation2 + $0x140] sm:$0xff]  ;;  %v1259_v39 = vld [vmem:[#allocation2 + $0x150] sm:$0xff]  ;;  %1346 = vmatpush.msra.mxu2 %v1258_v2  ;;  %v1260_v6 = vld [vmem:[#allocation2 + $0x158] sm:$0xff] }
0x1010   :  { %1326 = vmatpush.msrb.mxu3 %v1257_v21  ;;  %1366 = vmatpush.msrb.mxu0 %v1259_v39 }
0x1011   :  { %v1213_v5 = vmax.f32 %v1211_v28, 0.0  ;;  %v1253_v28 = vld [vmem:[#allocation2 + $0x120] sm:$0xff]  ;;  %1386 = vmatpush.msrb.mxu1 %v1260_v6 }
0x1012   :  { %1327 = vmatpush.msrb.mxu3 %v1253_v28  ;;  %1367 = vmatpush.msrb.mxu0 %v1255_v60 }
0x1013   :  { %1230 = vmatmul.f32.vlgmr.msra.gmra.mxu1 %v1213_v5  ;;  %v1254_v5 = vld [vmem:[#allocation2 + $0x128] sm:$0xff] }
0x1014   :  { %1347 = vmatpush.msra.mxu2 %v1254_v5  ;;  %1387 = vmatpush.msrb.mxu1 %v1256_v1 }
0x1015   :  { %1328 = vmatpush.msrb.mxu3 %v1249_v4  ;;  %1368 = vmatpush.msrb.mxu0 %v1251_v9 }
0x1016   :  { %1348 = vmatpush.msra.mxu2 %v1250_v7  ;;  %1388 = vmatpush.msrb.mxu1 %v1252_v63 }
0x1090   :  { %v1231_v38 = vpop.f32.mrf.mxu1 }
0x1091   :  { %v2323_v41 = vadd.f32 %v1231_v38, %v59_v0  ;;  %v1416_v0 = vperm.slane %v1396_v61, 1  ;;  %v1455_v61 = vand.u32 2147483648, %v2329_v29 }
0x1093   :  { %v1234_v17 = vmul.f32 %v2323_v41, %v2323_v41  ;;  %v1420_v54 = vsub.f32 %v1411_v45, %v1416_v0 }
0x1095   :  { %1235 = vadd.xlane.f32.xlu2 %v1234_v17  ;;  %v1421_v17 = vmul.f32 %v1405_v24, %v1405_v24  ;;  %v1428_v59 = vmul.f32 %v1420_v54, %v1420_v54 }
0x1097   :  { %v2327_v18 = vadd.f32 %v1425_v56, %v1421_v17  ;;  %v2333_v34 = vadd.f32 %v1428_v59, %v1424_v52 }
0x1099   :  { %vm1440_vm4 = vcmp.eq.f32.partialorder %v2327_v18, inf  ;;  %vm1442_vm5 = vcmp.eq.f32.partialorder %v2327_v18, 0.0  ;;  %v1443_v11 = vand.u32 2147483648, %v2327_v18  ;;  %vm1476_vm11 = vcmp.eq.f32.partialorder %v2333_v34, inf }
0x109a   :  { %v1479_v26 = vand.u32 2147483648, %v2333_v34  ;;  %vm1478_vm12 = vcmp.eq.f32.partialorder %v2333_v34, 0.0 }
0x1108   :  { %v1236_v38 = vpop.xlane.xlu2 %1235 }
0x1109   :  { %v1237_v10 = vmax.f32 %v1236_v38, 1e-24 }
0x110b   :  { %1634 = vrsqrt.f32 %v1237_v10  ;;  %vm1244_vm1 = vweird.f32 %v1237_v10 }
0x110c   :  { %1636 = vrsqrt.f32 %v2327_v18 }
0x110d   :  { %1638 = vrsqrt.f32 %v2329_v29 }
0x110e   :  { %1640 = vrsqrt.f32 %v2331_v12 }
0x110f   :  { %1642 = vrsqrt.f32 %v2333_v34 }
0x1111   :  { %v1635_v35 = vpop.eup %1634 }
0x1112   :  { %v1239_v36 = vmul.f32 %v1635_v35, %v1237_v10  ;;  %v1637_v43 = vpop.eup %1636  ;;  %vm1245_vm7 = vweird.f32 %v1635_v35 }
0x1113   :  { %v1639_v22 = vpop.eup %1638  ;;  %v1434_v37 = vmul.f32 %v1637_v43, %v2327_v18  ;;  %vm1246_vm3 = vmor %vm1244_vm1, %vm1245_vm7 }
0x1114   :  { %v1240_v42 = vmul.f32 %v1635_v35, %v1239_v36  ;;  %v1641_v48 = vpop.eup %1640  ;;  %v1446_v49 = vmul.f32 %v1639_v22, %v2329_v29 }
0x1115   :  { %v1643_v40 = vpop.eup %1642  ;;  %v1435_v50 = vmul.f32 %v1637_v43, %v1434_v37  ;;  %v1458_v53 = vmul.f32 %v1641_v48, %v2331_v12 }
0x1116   :  { %v1241_v20 = vmul.f32 0.5, %v1240_v42  ;;  %v1447_v55 = vmul.f32 %v1639_v22, %v1446_v49  ;;  %v1470_v3 = vmul.f32 %v1643_v40, %v2333_v34 }
0x1117   :  { %v1436_v2 = vmul.f32 0.5, %v1435_v50  ;;  %v1459_v39 = vmul.f32 %v1641_v48, %v1458_v53 }
0x1118   :  { %v1242_v46 = vsub.f32 1.5, %v1241_v20  ;;  %v1448_v6 = vmul.f32 0.5, %v1447_v55  ;;  %v1471_v28 = vmul.f32 %v1643_v40, %v1470_v3 }
0x1119   :  { %v1437_v60 = vsub.f32 1.5, %v1436_v2  ;;  %v1460_v1 = vmul.f32 0.5, %v1459_v39 }
0x111a   :  { %v1243_v21 = vmul.f32 %v1635_v35, %v1242_v46  ;;  %v1449_v7 = vsub.f32 1.5, %v1448_v6  ;;  %v1472_v9 = vmul.f32 0.5, %v1471_v28 }
0x111b   :  { %v1438_v63 = vmul.f32 %v1637_v43, %v1437_v60  ;;  %v1461_v13 = vsub.f32 1.5, %v1460_v1 }
0x111c   :  { %v1247_v5 = vsel %vm1246_vm3, %v1635_v35, %v1243_v21  ;;  %v1450_v15 = vmul.f32 %v1639_v22, %v1449_v7  ;;  %v1473_v16 = vsub.f32 1.5, %v1472_v9 }
0x111d   :  { %v1248_v4 = vmul.f32 %v1247_v5, %v2323_v41  ;;  %v1439_v41 = vmul.f32 %v1438_v63, %v2327_v18  ;;  %v1462_v14 = vmul.f32 %v1641_v48, %v1461_v13 }
0x111e   :  { %v1451_v19 = vmul.f32 %v1450_v15, %v2329_v29  ;;  %v1474_v23 = vmul.f32 %v1643_v40, %v1473_v16 }
0x111f   :  { %1329 = vmatmul.f32.vlgmr.msrb.gmra.mxu3 %v1248_v4  ;;  %1349 = vmatmul.f32.vlgmr.msra.gmra.mxu2 %v1248_v4  ;;  %v1441_v24 = vsel %vm1440_vm4, %v2327_v18, %v1439_v41  ;;  %v1463_v25 = vmul.f32 %v1462_v14, %v2331_v12 }
0x1120   :  { %1369 = vmatmul.f32.vlgmr.msrb.gmra.mxu0 %v1248_v4  ;;  %1389 = vmatmul.f32.vlgmr.msrb.gmra.mxu1 %v1248_v4  ;;  %v1444_v27 = vsel %vm1442_vm5, %v1443_v11, %v1441_v24  ;;  %v1453_v30 = vsel %vm1452_vm6, %v2329_v29, %v1451_v19  ;;  %v1475_v31 = vmul.f32 %v1474_v23, %v2333_v34 }
0x1121   :  { %v1456_v33 = vsel %vm1454_vm8, %v1455_v61, %v1453_v30  ;;  %v1465_v0 = vsel %vm1464_vm9, %v2331_v12, %v1463_v25  ;;  %1563 = vst [vmem:[%s2406_s10 + $0x40] sm:$0xff] %v1444_v27 }
0x1122   :  { %v1468_v38 = vsel %vm1466_vm10, %v1467_v8, %v1465_v0  ;;  %v1477_v17 = vsel %vm1476_vm11, %v2333_v34, %v1475_v31  ;;  %1564 = vst [vmem:[%s2406_s10 + $0x48] sm:$0xff] %v1456_v33 }
0x1123   :  { %v1480_v44 = vsel %vm1478_vm12, %v1479_v26, %v1477_v17  ;;  %1565 = vst [vmem:[%s2406_s10 + $0x50] sm:$0xff] %v1468_v38 }
0x1124   :  { %1566 = vst [vmem:[%s2406_s10 + $0x58] sm:$0xff] %v1480_v44 }
0x119d   :  { %v1370_v45 = vpop.f32.mrf.mxu0  ;;  %v1390_v10 = vpop.f32.mrf.mxu1 }
0x119e   :  { %1561 = vst [vmem:[%s2406_s10 + $0x30] sm:$0xff] %v1370_v45 }
0x119f   :  { %1562 = vst [vmem:[%s2406_s10 + $0x38] sm:$0xff] %v1390_v10 }
0x11a2   :  { %v1330_v32 = vpop.f32.mrf.mxu3  ;;  %v1350_v62 = vpop.f32.mrf.mxu2 }
0x11a3   :  { %1559 = vst [vmem:[%s2406_s10 + $0x20] sm:$0xff] %v1330_v32 }
0x11a4   :  { %1560 = vst [vmem:[%s2406_s10 + $0x28] sm:$0xff] %v1350_v62 }
0x11a5   :  { %1499 = vsyncpa [#allocation3], 1 }

</bundles_post_ra>
